<compile_context>
chip_gen: v5e
topology: v5e:2x2
jax: 0.10.0
libtpu: 0.0.40
codegen_flags: <defaults>
</compile_context>

<pallas_src>
import jax
import jax.numpy as jnp
from jax.experimental import pallas as pl
from jax.experimental.pallas import tpu as pltpu


def _layernorm(x, gamma, beta, eps=1e-5):
    mu = jnp.mean(x, axis=-1, keepdims=True)
    var = jnp.mean((x - mu) ** 2, axis=-1, keepdims=True)
    return (x - mu) * jax.lax.rsqrt(var + eps) * gamma + beta


def _attn_layer_kernel(q_ref, k_ref, v_ref, pvec_ref, w_ref, out_ref):
    Bb, nq, C = q_ref.shape
    nk = k_ref.shape[1]
    f32 = jnp.float32

    pv = pvec_ref[...]                      # (8, C+1) packed per-channel params
    w = w_ref[...]                          # (3, C, C+1) packed weights

    gq, bqln = pv[0:1, :C], pv[1:2, :C]
    gk, bkln = pv[2:3, :C], pv[3:4, :C]
    gv, bvln = pv[4:5, :C], pv[5:6, :C]
    bvs = pv[6:7, :]                        # (1, C+1) = [bv || bsem]
    bproj = pv[7:8, :C]                     # (1, C)

    wk_aug = w[0]                           # (C, C+1) = [s*wk@wq^T || s*wk@bq^T]
    wvs = w[1]                              # (C, C+1) = [wv || wsem]
    wproj = w[2, :, :C]                     # (C, C)

    # Row-wise work on flattened (Bb*rows, C) slabs -> single big matmuls.
    qn = _layernorm(q_ref[...].astype(f32).reshape(Bb * nq, C), gq, bqln)
    kn = _layernorm(k_ref[...].astype(f32).reshape(Bb * nk, C), gk, bkln)
    vn = _layernorm(v_ref[...].astype(f32).reshape(Bb * nk, C), gv, bvln)

    # Key path carries the folded q-projection plus the q-bias column.
    k_all = jnp.dot(kn, wk_aug, preferred_element_type=f32)        # (Bb*nk, C+1)
    # Value path carries [value proj || semantic] in one matmul.
    vps = jnp.dot(vn, wvs, preferred_element_type=f32) + bvs       # (Bb*nk, C+1)

    # Augmented key: extra lane column = (q-bias contribution) + semantic.
    k_aug = jnp.concatenate(
        [k_all[:, :C], k_all[:, C:] + vps[:, C:]], axis=1)         # (Bb*nk, C+1)
    # Augmented query: raw LN output + a ones column that multiplies the
    # extra key column (the q projection matmul itself was folded into wk_aug).
    q_aug = jnp.concatenate(
        [qn, jnp.ones((Bb * nq, 1), f32)], axis=1)                 # (Bb*nq, C+1)

    q3 = q_aug.reshape(Bb, nq, C + 1)
    k3 = k_aug.reshape(Bb, nk, C + 1)
    v3 = vps[:, :C].reshape(Bb, nk, C)

    # scores = (qp @ kp^T) * scale + semantic, expressed as one batched
    # contraction over C+1 (no transpose, no broadcast add).
    scores = jax.lax.dot_general(
        q3, k3, (((2,), (2,)), ((0,), (0,))),
        preferred_element_type=f32)                                # (Bb, nq, nk)

    scores = scores - jnp.max(scores, axis=-1, keepdims=True)
    p = jnp.exp(scores)
    denom = jnp.sum(p, axis=-1, keepdims=True)
    inv = pl.reciprocal(denom, approx=True)                        # EUP slot
    inv = inv * (2.0 - denom * inv)                                # 1 Newton step
    attn = p * inv

    ctx = jax.lax.dot_general(
        attn, v3, (((2,), (1,)), ((0,), (0,))),
        preferred_element_type=f32)                                # (Bb, nq, C)

    out = jnp.dot(ctx.reshape(Bb * nq, C), wproj,
                  preferred_element_type=f32) + bproj
    # residual: re-read the input block (no long-lived f32 copy kept around)
    out_ref[...] = (q_ref[...].astype(f32)
                    + out.reshape(Bb, nq, C)).astype(out_ref.dtype)


# --------------------------------------------------------------------------
# Hardware-aware blocking / VMEM accounting
# --------------------------------------------------------------------------
def _hw_caps():
    """Per-generation (block-budget, vmem-limit, tensorcore-count).

    Unknown parts are treated conservatively like v7x (64 MiB VMEM / TC,
    2 TensorCores).  v5e / v6e (single TC, 128 MiB VMEM) get the large budget
    and a single grid step whenever it fits.
    """
    kind = ""
    try:
        kind = jax.devices()[0].device_kind.lower()
    except Exception:
        pass
    single_tc = any(t in kind for t in
                    ("v2", "v3", "v5 lite", "v5e", "v5lite", "v6 lite", "v6e"))

    vmem_phys = None
    try:
        info = pltpu.get_tpu_info()
        vmem_phys = getattr(info, "vmem_capacity_bytes", None)
    except Exception:
        pass
    if single_tc:
        vmem_phys = vmem_phys or (128 << 20)
    else:
        # dual-TC / unknown: never assume more than 64 MiB per TensorCore
        vmem_phys = min(vmem_phys or (64 << 20), 64 << 20)

    cores = 1 if single_tc else 2
    block_budget = max(vmem_phys // 3, 8 << 20)          # per-step live-set target
    vmem_limit = min(int(vmem_phys * 3 // 4), 112 << 20)  # scoped-VMEM request
    return block_budget, vmem_limit, cores


def _working_set_bytes(bb, nq, nk, C):
    """Generous per-grid-step VMEM estimate (f32): 2x-buffered I/O blocks,
    2x-buffered packed params, and every in-kernel intermediate."""
    f = 4
    c1 = C + 1
    io = 2 * f * (2 * bb * nq * C + 2 * bb * nk * C)        # q,out + k,v blocks (x2 bufs)
    par = 2 * f * (8 * c1 + 3 * C * c1)                     # packed params (x2 bufs)
    live = f * (bb * nq * C + 2 * bb * nk * C               # qn, kn, vn
                + 2 * bb * nq * c1 + 3 * bb * nk * c1       # q_aug, k_all/k_aug, vps
                + 3 * bb * nq * nk                          # scores, p, attn
                + 2 * bb * nq * C)                          # ctx, out
    return io + par + live + (1 << 20)                      # + slack


def _pick_block_b(B, nq, nk, C, budget, cores):
    divs = [d for d in range(1, B + 1) if B % d == 0]
    fit = [d for d in divs if _working_set_bytes(d, nq, nk, C) <= budget] or [1]
    if cores > 1 and B > 1:
        balanced = [d for d in fit if (B // d) % cores == 0]
        if balanced:                      # keep an even grid so megacore balances
            return max(balanced)
    return max(fit)                       # single TC: fewest grid steps that fit


# --------------------------------------------------------------------------
# Parameters & wrapper
# --------------------------------------------------------------------------
def init_params(embed_dims, key):
    """Weights use the x @ W (in, out) convention (transpose of torch Linear)."""
    C = embed_dims
    ks = jax.random.split(key, 8)
    s = 0.05
    return dict(
        gq=jnp.ones((1, C), jnp.float32), bq_ln=jnp.zeros((1, C), jnp.float32),
        gk=jnp.ones((1, C), jnp.float32), bk_ln=jnp.zeros((1, C), jnp.float32),
        gv=jnp.ones((1, C), jnp.float32), bv_ln=jnp.zeros((1, C), jnp.float32),
        wq=s * jax.random.normal(ks[0], (C, C), jnp.float32),
        bq=s * jax.random.normal(ks[1], (1, C), jnp.float32),
        wk=s * jax.random.normal(ks[2], (C, C), jnp.float32),
        wv=s * jax.random.normal(ks[3], (C, C), jnp.float32),
        bv=s * jax.random.normal(ks[4], (1, C), jnp.float32),
        wsem=s * jax.random.normal(ks[5], (C, 1), jnp.float32),
        bsem=s * jax.random.normal(ks[6], (1, 1), jnp.float32),
        wproj=s * jax.random.normal(ks[7], (C, C), jnp.float32),
        bproj=jnp.zeros((1, C), jnp.float32),
    )


def _prep_packed_params(params, C, scale):
    f32 = jnp.float32
    wq = params["wq"].astype(f32)
    bq = params["bq"].astype(f32)
    wk = params["wk"].astype(f32)

    # Fold the whole q projection into the key path (algebraically exact):
    #   scores = (qn@wq + bq) @ (kn@wk)^T * s + sem
    #          = qn @ (kn @ (s*wk@wq^T))^T + (kn @ (s*wk@bq^T) + sem) * 1
    wk_aug = jnp.concatenate([scale * (wk @ wq.T), scale * (wk @ bq.T)], axis=1)
    wvs = jnp.concatenate([params["wv"], params["wsem"]], axis=1).astype(f32)
    wproj_pad = jnp.concatenate(
        [params["wproj"].astype(f32), jnp.zeros((C, 1), f32)], axis=1)
    w_all = jnp.stack([wk_aug, wvs, wproj_pad], axis=0)              # (3, C, C+1)

    pad1 = lambda v: jnp.concatenate(
        [v.astype(f32), jnp.zeros((1, 1), f32)], axis=1)
    bvs = jnp.concatenate([params["bv"], params["bsem"]], axis=1).astype(f32)
    pvec = jnp.concatenate(
        [pad1(params["gq"]), pad1(params["bq_ln"]),
         pad1(params["gk"]), pad1(params["bk_ln"]),
         pad1(params["gv"]), pad1(params["bv_ln"]),
         bvs, pad1(params["bproj"])], axis=0)                        # (8, C+1)
    return pvec, w_all


def basic_single_head_semantic_aug_attn_layer(
        query, key, value, query_pos_embed, key_pos_embed, params,
        reshape_back=True, block_b=None):
    B, C, qH, qW = query.shape
    _, N, _, kH, kW = key.shape
    nq = qH * qW
    nk = N * kH * kW
    scale = C ** (-0.5)

    if query_pos_embed is not None:
        query = query + query_pos_embed
    if key_pos_embed is not None:
        key = key + key_pos_embed

    # token layout: (B, seq, C)
    q_tok = query.reshape(B, C, nq).transpose(0, 2, 1)
    k_tok = key.transpose(0, 1, 3, 4, 2).reshape(B, nk, C)
    v_tok = value.transpose(0, 1, 3, 4, 2).reshape(B, nk, C)

    pvec, w_all = _prep_packed_params(params, C, scale)

    budget, vmem_limit, cores = _hw_caps()
    if block_b is None:
        block_b = _pick_block_b(B, nq, nk, C, budget, cores)
    assert B % block_b == 0, "block_b must divide B"
    grid = (B // block_b,)

    out_tok = pl.pallas_call(
        _attn_layer_kernel,
        out_shape=jax.ShapeDtypeStruct((B, nq, C), query.dtype),
        grid=grid,
        in_specs=[
            pl.BlockSpec((block_b, nq, C), lambda b: (b, 0, 0)),
            pl.BlockSpec((block_b, nk, C), lambda b: (b, 0, 0)),
            pl.BlockSpec((block_b, nk, C), lambda b: (b, 0, 0)),
            pl.BlockSpec((8, C + 1), lambda b: (0, 0)),
            pl.BlockSpec((3, C, C + 1), lambda b: (0, 0, 0)),
        ],
        out_specs=pl.BlockSpec((block_b, nq, C), lambda b: (b, 0, 0)),
        compiler_params=pltpu.CompilerParams(
            dimension_semantics=("parallel",),      # batches independent
            vmem_limit_bytes=int(vmem_limit)),
    )(q_tok, k_tok, v_tok, pvec, w_all)

    if reshape_back:
        return out_tok.transpose(0, 2, 1).reshape(B, C, qH, qW)
    return out_tok


# --------------------------------------------------------------------------
# Pure-JAX reference (mirrors the PyTorch forward, eval mode)
# --------------------------------------------------------------------------
def _reference(query, key, value, query_pos_embed, key_pos_embed, params,
               reshape_back=True):
    B, C, qH, qW = query.shape
    _, N, _, kH, kW = key.shape
    nq, nk = qH * qW, N * kH * kW
    scale = C ** (-0.5)
    if query_pos_embed is not None:
        query = query + query_pos_embed
    if key_pos_embed is not None:
        key = key + key_pos_embed
    q_tok = query.reshape(B, C, nq).transpose(0, 2, 1)
    k_tok = key.transpose(0, 1, 3, 4, 2).reshape(B, nk, C)
    v_tok = value.transpose(0, 1, 3, 4, 2).reshape(B, nk, C)

    def ln(x, g, b):
        mu = x.mean(-1, keepdims=True)
        var = ((x - mu) ** 2).mean(-1, keepdims=True)
        return (x - mu) / jnp.sqrt(var + 1e-5) * g + b

    p = params
    q = ln(q_tok, p["gq"], p["bq_ln"])
    k = ln(k_tok, p["gk"], p["bk_ln"])
    v = ln(v_tok, p["gv"], p["bv_ln"])
    qp = q @ p["wq"] + p["bq"]
    kp = k @ p["wk"]
    vp = v @ p["wv"] + p["bv"]
    semantic = (v @ p["wsem"] + p["bsem"][0, 0]).transpose(0, 2, 1)   # (B,1,nk)
    attn = qp @ kp.transpose(0, 2, 1) * scale + semantic
    attn = jax.nn.softmax(attn, axis=-1)
    out = attn @ vp
    out = out @ p["wproj"] + p["bproj"]
    out_tok = q_tok + out
    if reshape_back:
        return out_tok.transpose(0, 2, 1).reshape(B, C, qH, qW)
    return out_tok


if __name__ == "__main__":
    # small shapes consistent with the module's forward contract
    B, C = 2, 32          # embed_dims = 32
    qH = qW = 8           # query spatial -> nq = 64
    N, kH, kW = 2, 4, 4   # key/value: N cameras, kH x kW -> nk = 32

    root = jax.random.PRNGKey(0)
    k_in = jax.random.split(root, 6)
    query = jax.random.normal(k_in[0], (B, C, qH, qW), jnp.float32)
    key = jax.random.normal(k_in[1], (B, N, C, kH, kW), jnp.float32)
    value = jax.random.normal(k_in[2], (B, N, C, kH, kW), jnp.float32)
    query_pos = 0.1 * jax.random.normal(k_in[3], (B, C, qH, qW), jnp.float32)
    key_pos = 0.1 * jax.random.normal(k_in[4], (B, N, C, kH, kW), jnp.float32)

    params = init_params(C, k_in[5])

    ref = _reference(query, key, value, query_pos, key_pos, params,
                     reshape_back=True)

    # generation-aware default blocking (single step on v5e/v6e, even grid on
    # dual-TC parts)
    out = basic_single_head_semantic_aug_attn_layer(
        query, key, value, query_pos, key_pos, params, reshape_back=True)
    out = jax.block_until_ready(out)
    assert out.shape == (B, C, qH, qW)
    assert jnp.allclose(out, ref, rtol=1e-4, atol=1e-4), "mismatch vs reference"

    # explicitly exercise the multi-step pipelined path as well
    out2 = basic_single_head_semantic_aug_attn_layer(
        query, key, value, query_pos, key_pos, params, reshape_back=True,
        block_b=1)
    out2 = jax.block_until_ready(out2)
    assert jnp.allclose(out2, ref, rtol=1e-4, atol=1e-4), "mismatch (block_b=1)"

    print("KERNEL_OK")
</pallas_src>

<mosaic_0001>
module attributes {stable_mosaic.version = 11 : i64} {
  func.func @_attn_layer_kernel(%arg0: i32, %arg1: memref<1x64x32xf32, #tpu.memory_space<vmem>>, %arg2: memref<1x32x32xf32, #tpu.memory_space<vmem>>, %arg3: memref<1x32x32xf32, #tpu.memory_space<vmem>>, %arg4: memref<8x33xf32, #tpu.memory_space<vmem>>, %arg5: memref<3x32x33xf32, #tpu.memory_space<vmem>>, %arg6: memref<1x64x32xf32, #tpu.memory_space<vmem>>) attributes {dimension_semantics = [#tpu.dimension_semantics<parallel>], iteration_bounds = array<i64: 2>, scalar_prefetch = 0 : i64, scratch_operands = 0 : i64, tpu.core_type = #tpu.core_type<tc>, window_params = [{transform_indices = @transform_0, window_bounds = array<i64: 1, 64, 32>}, {transform_indices = @transform_1, window_bounds = array<i64: 1, 32, 32>}, {transform_indices = @transform_2, window_bounds = array<i64: 1, 32, 32>}, {pipeline_mode = #tpu.pipeline_mode<synchronous>, transform_indices = @transform_3, window_bounds = array<i64: 8, 33>}, {pipeline_mode = #tpu.pipeline_mode<synchronous>, transform_indices = @transform_4, window_bounds = array<i64: 3, 32, 33>}, {transform_indices = @transform_5, window_bounds = array<i64: 1, 64, 32>}]} {
    %c0 = arith.constant 0 : index
    %c0_0 = arith.constant 0 : index
    %0 = vector.load %arg4[%c0, %c0_0] : memref<8x33xf32, #tpu.memory_space<vmem>>, vector<8x33xf32>
    %c0_1 = arith.constant 0 : index
    %c0_2 = arith.constant 0 : index
    %c0_3 = arith.constant 0 : index
    %1 = vector.load %arg5[%c0_1, %c0_2, %c0_3] : memref<3x32x33xf32, #tpu.memory_space<vmem>>, vector<3x32x33xf32>
    %2 = vector.extract_strided_slice %0 {offsets = [0, 0], sizes = [1, 32], strides = [1, 1]} : vector<8x33xf32> to vector<1x32xf32>
    %3 = vector.extract_strided_slice %0 {offsets = [1, 0], sizes = [1, 32], strides = [1, 1]} : vector<8x33xf32> to vector<1x32xf32>
    %4 = vector.extract_strided_slice %0 {offsets = [2, 0], sizes = [1, 32], strides = [1, 1]} : vector<8x33xf32> to vector<1x32xf32>
    %5 = vector.extract_strided_slice %0 {offsets = [3, 0], sizes = [1, 32], strides = [1, 1]} : vector<8x33xf32> to vector<1x32xf32>
    %6 = vector.extract_strided_slice %0 {offsets = [4, 0], sizes = [1, 32], strides = [1, 1]} : vector<8x33xf32> to vector<1x32xf32>
    %7 = vector.extract_strided_slice %0 {offsets = [5, 0], sizes = [1, 32], strides = [1, 1]} : vector<8x33xf32> to vector<1x32xf32>
    %8 = vector.extract_strided_slice %0 {offsets = [6, 0], sizes = [1, 33], strides = [1, 1]} : vector<8x33xf32> to vector<1x33xf32>
    %9 = vector.extract_strided_slice %0 {offsets = [7, 0], sizes = [1, 32], strides = [1, 1]} : vector<8x33xf32> to vector<1x32xf32>
    %10 = vector.extract_strided_slice %1 {offsets = [0, 0, 0], sizes = [1, 32, 33], strides = [1, 1, 1]} : vector<3x32x33xf32> to vector<1x32x33xf32>
    %11 = vector.shape_cast %10 : vector<1x32x33xf32> to vector<32x33xf32>
    %12 = vector.extract_strided_slice %1 {offsets = [1, 0, 0], sizes = [1, 32, 33], strides = [1, 1, 1]} : vector<3x32x33xf32> to vector<1x32x33xf32>
    %13 = vector.shape_cast %12 : vector<1x32x33xf32> to vector<32x33xf32>
    %14 = vector.extract_strided_slice %1 {offsets = [2, 0, 0], sizes = [1, 32, 32], strides = [1, 1, 1]} : vector<3x32x33xf32> to vector<1x32x32xf32>
    %15 = vector.shape_cast %14 : vector<1x32x32xf32> to vector<32x32xf32>
    %c0_4 = arith.constant 0 : index
    %c0_5 = arith.constant 0 : index
    %c0_6 = arith.constant 0 : index
    %16 = vector.load %arg1[%c0_4, %c0_5, %c0_6] : memref<1x64x32xf32, #tpu.memory_space<vmem>>, vector<1x64x32xf32>
    %17 = vector.shape_cast %16 : vector<1x64x32xf32> to vector<64x32xf32>
    %cst = arith.constant dense<0.000000e+00> : vector<64xf32>
    %18 = vector.multi_reduction <add>, %17, %cst [1] : vector<64x32xf32> to vector<64xf32>
    %19 = vector.shape_cast %18 : vector<64xf32> to vector<64x1xf32>
    %cst_7 = arith.constant 3.200000e+01 : f32
    %20 = vector.broadcast %cst_7 : f32 to vector<64x1xf32>
    %21 = arith.divf %19, %20 : vector<64x1xf32>
    %22 = vector.broadcast %21 : vector<64x1xf32> to vector<64x32xf32>
    %23 = arith.subf %17, %22 : vector<64x32xf32>
    %24 = arith.mulf %23, %23 : vector<64x32xf32>
    %cst_8 = arith.constant dense<0.000000e+00> : vector<64xf32>
    %25 = vector.multi_reduction <add>, %24, %cst_8 [1] : vector<64x32xf32> to vector<64xf32>
    %26 = vector.shape_cast %25 : vector<64xf32> to vector<64x1xf32>
    %cst_9 = arith.constant 3.200000e+01 : f32
    %27 = vector.broadcast %cst_9 : f32 to vector<64x1xf32>
    %28 = arith.divf %26, %27 : vector<64x1xf32>
    %29 = vector.broadcast %21 : vector<64x1xf32> to vector<64x32xf32>
    %30 = arith.subf %17, %29 : vector<64x32xf32>
    %cst_10 = arith.constant 9.99999974E-6 : f32
    %31 = vector.broadcast %cst_10 : f32 to vector<64x1xf32>
    %32 = arith.addf %28, %31 : vector<64x1xf32>
    %33 = math.rsqrt %32 : vector<64x1xf32>
    %34 = vector.broadcast %33 : vector<64x1xf32> to vector<64x32xf32>
    %35 = arith.mulf %30, %34 : vector<64x32xf32>
    %36 = vector.broadcast %2 : vector<1x32xf32> to vector<64x32xf32>
    %37 = arith.mulf %35, %36 : vector<64x32xf32>
    %38 = vector.broadcast %3 : vector<1x32xf32> to vector<64x32xf32>
    %39 = arith.addf %37, %38 : vector<64x32xf32>
    %c0_11 = arith.constant 0 : index
    %c0_12 = arith.constant 0 : index
    %c0_13 = arith.constant 0 : index
    %40 = vector.load %arg2[%c0_11, %c0_12, %c0_13] : memref<1x32x32xf32, #tpu.memory_space<vmem>>, vector<1x32x32xf32>
    %41 = vector.shape_cast %40 : vector<1x32x32xf32> to vector<32x32xf32>
    %cst_14 = arith.constant dense<0.000000e+00> : vector<32xf32>
    %42 = vector.multi_reduction <add>, %41, %cst_14 [1] : vector<32x32xf32> to vector<32xf32>
    %43 = vector.shape_cast %42 : vector<32xf32> to vector<32x1xf32>
    %cst_15 = arith.constant 3.200000e+01 : f32
    %44 = vector.broadcast %cst_15 : f32 to vector<32x1xf32>
    %45 = arith.divf %43, %44 : vector<32x1xf32>
    %46 = vector.broadcast %45 : vector<32x1xf32> to vector<32x32xf32>
    %47 = arith.subf %41, %46 : vector<32x32xf32>
    %48 = arith.mulf %47, %47 : vector<32x32xf32>
    %cst_16 = arith.constant dense<0.000000e+00> : vector<32xf32>
    %49 = vector.multi_reduction <add>, %48, %cst_16 [1] : vector<32x32xf32> to vector<32xf32>
    %50 = vector.shape_cast %49 : vector<32xf32> to vector<32x1xf32>
    %cst_17 = arith.constant 3.200000e+01 : f32
    %51 = vector.broadcast %cst_17 : f32 to vector<32x1xf32>
    %52 = arith.divf %50, %51 : vector<32x1xf32>
    %53 = vector.broadcast %45 : vector<32x1xf32> to vector<32x32xf32>
    %54 = arith.subf %41, %53 : vector<32x32xf32>
    %cst_18 = arith.constant 9.99999974E-6 : f32
    %55 = vector.broadcast %cst_18 : f32 to vector<32x1xf32>
    %56 = arith.addf %52, %55 : vector<32x1xf32>
    %57 = math.rsqrt %56 : vector<32x1xf32>
    %58 = vector.broadcast %57 : vector<32x1xf32> to vector<32x32xf32>
    %59 = arith.mulf %54, %58 : vector<32x32xf32>
    %60 = vector.broadcast %4 : vector<1x32xf32> to vector<32x32xf32>
    %61 = arith.mulf %59, %60 : vector<32x32xf32>
    %62 = vector.broadcast %5 : vector<1x32xf32> to vector<32x32xf32>
    %63 = arith.addf %61, %62 : vector<32x32xf32>
    %c0_19 = arith.constant 0 : index
    %c0_20 = arith.constant 0 : index
    %c0_21 = arith.constant 0 : index
    %64 = vector.load %arg3[%c0_19, %c0_20, %c0_21] : memref<1x32x32xf32, #tpu.memory_space<vmem>>, vector<1x32x32xf32>
    %65 = vector.shape_cast %64 : vector<1x32x32xf32> to vector<32x32xf32>
    %cst_22 = arith.constant dense<0.000000e+00> : vector<32xf32>
    %66 = vector.multi_reduction <add>, %65, %cst_22 [1] : vector<32x32xf32> to vector<32xf32>
    %67 = vector.shape_cast %66 : vector<32xf32> to vector<32x1xf32>
    %cst_23 = arith.constant 3.200000e+01 : f32
    %68 = vector.broadcast %cst_23 : f32 to vector<32x1xf32>
    %69 = arith.divf %67, %68 : vector<32x1xf32>
    %70 = vector.broadcast %69 : vector<32x1xf32> to vector<32x32xf32>
    %71 = arith.subf %65, %70 : vector<32x32xf32>
    %72 = arith.mulf %71, %71 : vector<32x32xf32>
    %cst_24 = arith.constant dense<0.000000e+00> : vector<32xf32>
    %73 = vector.multi_reduction <add>, %72, %cst_24 [1] : vector<32x32xf32> to vector<32xf32>
    %74 = vector.shape_cast %73 : vector<32xf32> to vector<32x1xf32>
    %cst_25 = arith.constant 3.200000e+01 : f32
    %75 = vector.broadcast %cst_25 : f32 to vector<32x1xf32>
    %76 = arith.divf %74, %75 : vector<32x1xf32>
    %77 = vector.broadcast %69 : vector<32x1xf32> to vector<32x32xf32>
    %78 = arith.subf %65, %77 : vector<32x32xf32>
    %cst_26 = arith.constant 9.99999974E-6 : f32
    %79 = vector.broadcast %cst_26 : f32 to vector<32x1xf32>
    %80 = arith.addf %76, %79 : vector<32x1xf32>
    %81 = math.rsqrt %80 : vector<32x1xf32>
    %82 = vector.broadcast %81 : vector<32x1xf32> to vector<32x32xf32>
    %83 = arith.mulf %78, %82 : vector<32x32xf32>
    %84 = vector.broadcast %6 : vector<1x32xf32> to vector<32x32xf32>
    %85 = arith.mulf %83, %84 : vector<32x32xf32>
    %86 = vector.broadcast %7 : vector<1x32xf32> to vector<32x32xf32>
    %87 = arith.addf %85, %86 : vector<32x32xf32>
    %cst_27 = arith.constant dense<0.000000e+00> : vector<32x33xf32>
    %88 = tpu.matmul %63, %11, %cst_27 {dimension_numbers = #tpu.dot_dimension_numbers<[1], [0], [0], [1], [0, 0, 1, 1], [], []>} : vector<32x32xf32>, vector<32x33xf32>, vector<32x33xf32> -> vector<32x33xf32>
    %cst_28 = arith.constant dense<0.000000e+00> : vector<32x33xf32>
    %89 = tpu.matmul %87, %13, %cst_28 {dimension_numbers = #tpu.dot_dimension_numbers<[1], [0], [0], [1], [0, 0, 1, 1], [], []>} : vector<32x32xf32>, vector<32x33xf32>, vector<32x33xf32> -> vector<32x33xf32>
    %90 = vector.broadcast %8 : vector<1x33xf32> to vector<32x33xf32>
    %91 = arith.addf %89, %90 : vector<32x33xf32>
    %92 = vector.extract_strided_slice %88 {offsets = [0, 0], sizes = [32, 32], strides = [1, 1]} : vector<32x33xf32> to vector<32x32xf32>
    %93 = vector.extract_strided_slice %88 {offsets = [0, 32], sizes = [32, 1], strides = [1, 1]} : vector<32x33xf32> to vector<32x1xf32>
    %94 = vector.extract_strided_slice %91 {offsets = [0, 32], sizes = [32, 1], strides = [1, 1]} : vector<32x33xf32> to vector<32x1xf32>
    %95 = arith.addf %93, %94 : vector<32x1xf32>
    %96 = tpu.concatenate %92, %95 in 1 : vector<32x32xf32>, vector<32x1xf32> -> vector<32x33xf32>
    %cst_29 = arith.constant 1.000000e+00 : f32
    %97 = vector.broadcast %cst_29 : f32 to vector<64x1xf32>
    %98 = tpu.concatenate %39, %97 in 1 : vector<64x32xf32>, vector<64x1xf32> -> vector<64x33xf32>
    %99 = vector.shape_cast %98 : vector<64x33xf32> to vector<1x64x33xf32>
    %100 = vector.shape_cast %96 : vector<32x33xf32> to vector<1x32x33xf32>
    %101 = vector.extract_strided_slice %91 {offsets = [0, 0], sizes = [32, 32], strides = [1, 1]} : vector<32x33xf32> to vector<32x32xf32>
    %102 = vector.shape_cast %101 : vector<32x32xf32> to vector<1x32x32xf32>
    %cst_30 = arith.constant dense<0.000000e+00> : vector<1x64x32xf32>
    %103 = tpu.matmul %99, %100, %cst_30 {dimension_numbers = #tpu.dot_dimension_numbers<[2], [2], [1], [1], [0, 0, 0, 1, 1, 1], [0], [0]>} : vector<1x64x33xf32>, vector<1x32x33xf32>, vector<1x64x32xf32> -> vector<1x64x32xf32>
    %cst_31 = arith.constant dense<0xFF800000> : vector<1x64xf32>
    %104 = vector.multi_reduction <maximumf>, %103, %cst_31 [2] : vector<1x64x32xf32> to vector<1x64xf32>
    %105 = vector.shape_cast %104 : vector<1x64xf32> to vector<1x64x1xf32>
    %106 = vector.broadcast %105 : vector<1x64x1xf32> to vector<1x64x32xf32>
    %107 = arith.subf %103, %106 : vector<1x64x32xf32>
    %108 = math.exp %107 : vector<1x64x32xf32>
    %cst_32 = arith.constant dense<0.000000e+00> : vector<1x64xf32>
    %109 = vector.multi_reduction <add>, %108, %cst_32 [2] : vector<1x64x32xf32> to vector<1x64xf32>
    %110 = vector.shape_cast %109 : vector<1x64xf32> to vector<1x64x1xf32>
    %111 = tpu.reciprocal %110 {approx = true} : vector<1x64x1xf32> -> vector<1x64x1xf32>
    %112 = arith.mulf %110, %111 : vector<1x64x1xf32>
    %cst_33 = arith.constant 2.000000e+00 : f32
    %113 = vector.broadcast %cst_33 : f32 to vector<1x64x1xf32>
    %114 = arith.subf %113, %112 : vector<1x64x1xf32>
    %115 = arith.mulf %111, %114 : vector<1x64x1xf32>
    %116 = vector.broadcast %115 : vector<1x64x1xf32> to vector<1x64x32xf32>
    %117 = arith.mulf %108, %116 : vector<1x64x32xf32>
    %cst_34 = arith.constant dense<0.000000e+00> : vector<1x64x32xf32>
    %118 = tpu.matmul %117, %102, %cst_34 {dimension_numbers = #tpu.dot_dimension_numbers<[2], [1], [1], [2], [0, 0, 0, 1, 1, 2], [0], [0]>} : vector<1x64x32xf32>, vector<1x32x32xf32>, vector<1x64x32xf32> -> vector<1x64x32xf32>
    %119 = vector.shape_cast %118 : vector<1x64x32xf32> to vector<64x32xf32>
    %cst_35 = arith.constant dense<0.000000e+00> : vector<64x32xf32>
    %120 = tpu.matmul %119, %15, %cst_35 {dimension_numbers = #tpu.dot_dimension_numbers<[1], [0], [0], [1], [0, 0, 1, 1], [], []>} : vector<64x32xf32>, vector<32x32xf32>, vector<64x32xf32> -> vector<64x32xf32>
    %121 = vector.broadcast %9 : vector<1x32xf32> to vector<64x32xf32>
    %122 = arith.addf %120, %121 : vector<64x32xf32>
    %c0_36 = arith.constant 0 : index
    %c0_37 = arith.constant 0 : index
    %c0_38 = arith.constant 0 : index
    %123 = vector.load %arg1[%c0_36, %c0_37, %c0_38] : memref<1x64x32xf32, #tpu.memory_space<vmem>>, vector<1x64x32xf32>
    %124 = vector.shape_cast %122 : vector<64x32xf32> to vector<1x64x32xf32>
    %125 = arith.addf %123, %124 : vector<1x64x32xf32>
    %c0_39 = arith.constant 0 : index
    %c0_40 = arith.constant 0 : index
    %c0_41 = arith.constant 0 : index
    %126 = vector.load %arg6[%c0_39, %c0_40, %c0_41] : memref<1x64x32xf32, #tpu.memory_space<vmem>>, vector<1x64x32xf32>
    tpu.vector_store %arg6[%c0_39, %c0_40, %c0_41], %125 {strides = array<i32>} : memref<1x64x32xf32, #tpu.memory_space<vmem>>, vector<1x64x32xf32>,
    return
  }
  func.func @transform_0(%arg0: i32) -> (i32, i32, i32) {
    %c0_i32 = arith.constant 0 : i32
    %c0_i32_0 = arith.constant 0 : i32
    %c0_i32_1 = arith.constant 0 : i32
    return %arg0, %c0_i32, %c0_i32_0 : i32, i32, i32
  }
  func.func @transform_1(%arg0: i32) -> (i32, i32, i32) {
    %c0_i32 = arith.constant 0 : i32
    %c0_i32_0 = arith.constant 0 : i32
    %c0_i32_1 = arith.constant 0 : i32
    return %arg0, %c0_i32, %c0_i32_0 : i32, i32, i32
  }
  func.func @transform_2(%arg0: i32) -> (i32, i32, i32) {
    %c0_i32 = arith.constant 0 : i32
    %c0_i32_0 = arith.constant 0 : i32
    %c0_i32_1 = arith.constant 0 : i32
    return %arg0, %c0_i32, %c0_i32_0 : i32, i32, i32
  }
  func.func @transform_3(%arg0: i32) -> (i32, i32) {
    %c0_i32 = arith.constant 0 : i32
    %c0_i32_0 = arith.constant 0 : i32
    %c0_i32_1 = arith.constant 0 : i32
    return %c0_i32, %c0_i32_0 : i32, i32
  }
  func.func @transform_4(%arg0: i32) -> (i32, i32, i32) {
    %c0_i32 = arith.constant 0 : i32
    %c0_i32_0 = arith.constant 0 : i32
    %c0_i32_1 = arith.constant 0 : i32
    %c0_i32_2 = arith.constant 0 : i32
    return %c0_i32, %c0_i32_0, %c0_i32_1 : i32, i32, i32
  }
  func.func @transform_5(%arg0: i32) -> (i32, i32, i32) {
    %c0_i32 = arith.constant 0 : i32
    %c0_i32_0 = arith.constant 0 : i32
    %c0_i32_1 = arith.constant 0 : i32
    return %arg0, %c0_i32, %c0_i32_0 : i32, i32, i32
  }
}

</mosaic_0001>

<bundles_post_ra>
// kernel: tpu_custom_call.1
= control target key start
LH: loop header
LB: loop body
LE: loop exit
PB: predicated region body
PF: predicated region fallthrough
CT: control target
= control target key end

     0   :  { %10 = vsyncpa [#allocation3], 0  ;;  %s2158_s0 = inlined_call_operand.vmem [shape: f32[2,64,32], index: 0, kind: input, shape index: {}]   ;;  %s2159_s1 = inlined_call_operand.vmem [shape: f32[2,32,32], index: 1, kind: input, shape index: {}]   ;;  %s2160_s2 = inlined_call_operand.hbm [shape: f32[2,32,32], index: 2, kind: input, shape index: {}]   ;;  %s2161_s3 = inlined_call_operand.vmem [shape: f32[8,33], index: 3, kind: input, shape index: {}]   ;;  %s2162_s4 = inlined_call_operand.vmem [shape: f32[3,32,33], index: 4, kind: input, shape index: {}]   ;;  %s2163_s5 = inlined_call_operand.vmem [shape: f32[2,64,32], index: 5, kind: output, shape index: {}]  }
   0x1   :  { %12 = vsyncpa [#allocation3 + $0x1], 0  ;;  %s1513_s18 = smov 0   ;;  %s1515_s19 = smov 0  }
   0x2   :  { %s1517_s20 = smov 0   ;;  %s1519_s21 = smov 0  }
   0x3 LB: > { %s1532_s22 = sadd.s32 4294967295, %s1478_s21   ;;  %s1535_s23 = sadd.s32 1, %s1478_s21   ;;  %s1478_s21 = sphi %s1519_s21, %s2182_s21   ;;  %s1474_s20 = sphi %s1517_s20, %s2181_s20   ;;  %s1470_s19 = sphi %s1515_s19, %s2180_s19   ;;  %s1466_s18 = sphi %s1513_s18, %s2179_s18  }
   0x4   : > { %s74_s24 = ssub.s32 %s1478_s21, %s1535_s23  ;;  %s77_s25 = sadd.s32 1, %s1474_s20 }
   0x5   : > { %p75_p0 = scmp.eq.s32.totalorder %s74_s24, 0  ;;  %p84_p1 = scmp.ne.s32.totalorder %s1474_s20, %s1470_s19 }
   0x6   : > { %p85_p2 = scmp.eq.s32.totalorder %s1478_s21, 0  ;;  %p90_p3 = scmp.ne.s32.totalorder %s1470_s19, %s1466_s18 }
   0x7   : > { %s1545_s26 = scalar_select %p75_p0, %s1474_s20, %s77_s25  }
   0x8   : > { %p1547_p4 = por %p85_p2, %p84_p1  ;;  %p91_p5 = scmp.eq.s32.totalorder %s1532_s22, 0 }
   0x9   : > { %p1303_p6 = scmp.lt.s32.totalorder %s1478_s21, 2  ;;  %s204_s29 = sand.u32 1, %s1474_s20  }
   0xa   : > { %p1553_p7 = por %p91_p5, %p90_p3  ;;  %s1244_s30 = sshll.u32 %s204_s29, 5 }
   0xb   : > { %s1293_s6 = sshll.u32 %s1478_s21, 5  ;;  %s208_s10 = scalar_lea.vmem [#allocation2], %s1244_s30 }
   0xc   : > { %s213_s9 = scalar_lea.hbm %s2160_s2, %s1293_s6  ;;  %s216_s11 = sshll.u32 %s208_s10, 4  ;;  %s217_s11 = int_to_ptr.vmem [resolvable:$true] %s216_s11 }
   0xd   : > { %s214_s12 = sshll.u32 %s213_s9, 4  ;;  %p1564_p8 = pnand %p1303_p6, %p1547_p4  ;;  %s215_s12 = int_to_ptr.hbm [resolvable:$true] %s214_s12 }
   0xe   : > { %p1247_p9 = scmp.ge.s32.totalorder %s1478_s21, 1  ;;  %s205_s14 = scalar_lea.sflag [#allocation3], %s204_s29 }
   0xf   : > { %s1414_s15 = sshra.s32 %s215_s12, 4  ;;  %p1418_p11 = pneg %p1564_p8  ;;  %s1415_s15 = int_to_ptr.hbm [resolvable:$true] %s1414_s15 }
  0x10   : > { %s1416_s16 = scalar_lea.hbm %s1415_s15, 32  ;;  %s1421_s24 = scalar_lea.hbm %s2160_s2, 64 }
  0x11   : > { %p1417_p10 = scmp.ne.s32.totalorder %s1415_s15, %s1416_s16  ;;  %p1422_p0 = scmp.lt.s32.totalorder %s1415_s15, %s2160_s2 }
  0x12   : > { %p1423_p1 = scmp.lt.s32.totalorder %s1421_s24, %s1416_s16 }
  0x13   : > { %p1419_p12 = pnand %p1418_p11, %p1417_p10 }
  0x14   : > { %p1424_p2 = por %p1423_p1, %p1422_p0 }
  0x15   : > { %p1420_p13 = pneg %p1419_p12 }
  0x17   : > { %p1425_p3 = pnand %p1424_p2, %p1420_p13 }
  0x19   : > { %1428 = shalt.err (!%p1425_p3)
}
  0x1a   : > { %s1480_s29 = smov 128   ;;  %s1481_s30 = smov 8  }
  0x1b   : > { %1302 = dma.hbm_to_vmem [thread:$0]  (!%p1564_p8), %s215_s12, 512, %s217_s11, %s205_s14, %s1480_s29, %s1480_s29, %s1481_s30  }
  0x1c   : > { %p224_p4 = scmp.lt.s32.totalorder %s1478_s21, 3 }
  0x1e   : > { %p225_p5 = pnand %p1247_p9, %p224_p4 }
  0x1f   : > { %s230_s6 = sand.u32 (!%p225_p5), 1, %s1470_s19  }
  0x20   : > { %228 = sbr.rel (%p225_p5) target bundleno = 1300 (0x514), region = 40  ;;  %s1248_s7 = sshll.u32 (!%p225_p5), %s230_s6, 5 }
  0x21   : > { %s231_s8 = scalar_lea.sflag (!%p225_p5), [#allocation3], %s230_s6  ;;  %s1583_s9 = scalar_lea.vmem (!%p225_p5), [#allocation2], %s1248_s7 }
  0x25   : > { %1461 = dma.done.wait (%p1553_p7), %s231_s8, 512  }
  0x26   : > { %1463 = vsyncadd (%p1553_p7), %s231_s8, 4294966784  ;;  %p272_p6 = scmp.lt.s32.totalorder %s1532_s22, 1  ;;  %vm308_vm0 = vcmask 261120   ;;  %v612_v0 = vld [vmem:[%s1583_s9] sm:$0xff]  ;;  %v613_v6 = vld [vmem:[%s1583_s9 + $0x8] sm:$0xff]  ;;  %v1482_v14 = vmov 32.0  }
  0x27   : > { %v616_v3 = vsel %vm308_vm0, %v612_v0, 0.0  ;;  %v619_v9 = vsel %vm308_vm0, %v613_v6, 0.0  ;;  %v614_v12 = vld [vmem:[%s1583_s9 + $0x10] sm:$0xff]  ;;  %1339 = vrcp.f32 %v1482_v14  ;;  %v1628_v40 = vld [vmem:[%s1583_s9 + $0x18] sm:$0xff] }
  0x28   : > { %s2184_s22 = smov (!%p272_p6, %s1532_s22), 1  ;;  %617 = vadd.xlane.f32.xlu2 %v616_v3  ;;  %v622_v13 = vsel %vm308_vm0, %v614_v12, 0.0  ;;  %v625_v45 = vsel %vm308_vm0, %v1628_v40, 0.0 }
  0x29   : > { %s1295_s21 = sshll.u32 %s2184_s22, 5  ;;  %s1294_s28 = sshll.u32 %s2184_s22, 6 }
  0x2a   : > { %s281_s12 = scalar_lea.vmem %s2159_s1, %s1295_s21  ;;  %s1648_s15 = scalar_lea.vmem %s2158_s0, %s1294_s28 }
  0x2b   : > { %v512_v1 = vld [vmem:[%s281_s12 + $0x10] sm:$0xff]  ;;  %v510_v2 = vld [vmem:[%s281_s12] sm:$0xff]  ;;  %v513_v7 = vld [vmem:[%s281_s12 + $0x18] sm:$0xff]  ;;  %s2119_s21 = scalar_lea.vmem %s2163_s5, %s1294_s28 }
  0x2c   : > { %v520_v4 = vsel %vm308_vm0, %v512_v1, 0.0  ;;  %v514_v5 = vsel %vm308_vm0, %v510_v2, 0.0  ;;  %v511_v8 = vld [vmem:[%s281_s12 + $0x8] sm:$0xff]  ;;  %v523_v10 = vsel %vm308_vm0, %v513_v7, 0.0  ;;  %v1658_v53 = vld [vmem:[%s1648_s15] sm:$0xff]  ;;  %v1669_v59 = vld [vmem:[%s1648_s15 + $0x18] sm:$0xff] }
  0x2d   : > { %521 = vadd.xlane.f32.xlu1 %v520_v4  ;;  %515 = vadd.xlane.f32.xlu0 %v514_v5  ;;  %v517_v11 = vsel %vm308_vm0, %v511_v8, 0.0  ;;  %v1340_v15 = vpop.eup %1339  ;;  %v309_v54 = vsel %vm308_vm0, %v1658_v53, 0.0  ;;  %v318_v60 = vsel %vm308_vm0, %v1669_v59, 0.0  ;;  %v1675_v62 = vld [vmem:[%s1648_s15 + $0x8] sm:$0xff]  ;;  %v291_v4 = vld [vmem:[%s2162_s4 + $0x18] sm:$0xff]  ;;  %v290_v5 = vld [vmem:[%s2162_s4 + $0x10] sm:$0xff] }
  0x2e   : > { %v334_v16 = vmul.f32 32.0, %v1340_v15  ;;  %vm338_vm1 = vweird.f32 %v1340_v15  ;;  %v312_v63 = vsel %vm308_vm0, %v1675_v62, 0.0  ;;  %738 = vmatpush.msra.mxu1 %v291_v4 }
  0x30   : > { %620 = vadd.xlane.f32.xlu2 %v619_v9  ;;  %v335_v17 = vsub.f32 1.0, %v334_v16  ;;  %739 = vmatpush.msra.mxu1 %v290_v5  ;;  %v293_v5 = vld [vmem:[%s2162_s4 + $0x28] sm:$0xff] }
  0x32   : > { %v336_v18 = vmul.f32 %v1340_v15, %v335_v17 }
  0x34   : > { %v337_v19 = vadd.f32 %v1340_v15, %v336_v18 }
  0x35   : > { %524 = vadd.xlane.f32.xlu1 %v523_v10  ;;  %518 = vadd.xlane.f32.xlu0 %v517_v11 }
  0x36   : > { %v1607_v20 = vsel %vm338_vm1, %v1340_v15, %v337_v19 }
  0x3d   : > { %623 = vadd.xlane.f32.xlu1 %v622_v13 }
  0x9b   : > { %v618_v21 = vpop.xlane.xlu2 %617 }
  0x9c   : > { %v628_v36 = vmul.f32 %v618_v21, %v1607_v20 }
  0x9e   : > { %v1635_v43 = vsub.f32 %v612_v0, %v628_v36  ;;  %v1680_v0 = vld [vmem:[%s1648_s15 + $0x20] sm:$0xff] }
  0xa0   : > { %v522_v22 = vpop.xlane.xlu1 %521  ;;  %v516_v24 = vpop.xlane.xlu0 %515  ;;  %v636_v51 = vmul.f32 %v1635_v43, %v1635_v43 }
  0xa1   : > { %v528_v23 = vmul.f32 %v522_v22, %v1607_v20  ;;  %v526_v25 = vmul.f32 %v516_v24, %v1607_v20 }
  0xa2   : > { %v640_v56 = vsel %vm308_vm0, %v636_v51, 0.0 }
  0xa3   : > { %v1611_v26 = vsub.f32 %v512_v1, %v528_v23  ;;  %v1613_v27 = vsub.f32 %v510_v2, %v526_v25  ;;  %v621_v31 = vpop.xlane.xlu2 %620  ;;  %v321_v1 = vsel %vm308_vm0, %v1680_v0, 0.0  ;;  %v1685_v2 = vld [vmem:[%s1648_s15 + $0x30] sm:$0xff] }
  0xa4   : > { %v629_v34 = vmul.f32 %v621_v31, %v1607_v20  ;;  %v327_v3 = vsel %vm308_vm0, %v1685_v2, 0.0 }
  0xa5   : > { %v536_v28 = vmul.f32 %v1611_v26, %v1611_v26  ;;  %v534_v29 = vmul.f32 %v1613_v27, %v1613_v27 }
  0xa6   : > { %v1625_v39 = vsub.f32 %v613_v6, %v629_v34  ;;  %v289_v6 = vld [vmem:[%s2162_s4 + $0x8] sm:$0xff] }
  0xa7   : > { %v544_v30 = vsel %vm308_vm0, %v536_v28, 0.0  ;;  %v538_v32 = vsel %vm308_vm0, %v534_v29, 0.0  ;;  %740 = vmatpush.msra.mxu1 %v289_v6 }
  0xa8   : > { %545 = vadd.xlane.f32.xlu1 %v544_v30  ;;  %v525_v33 = vpop.xlane.xlu1 %524  ;;  %539 = vadd.xlane.f32.xlu0 %v538_v32  ;;  %v519_v35 = vpop.xlane.xlu0 %518  ;;  %v637_v42 = vmul.f32 %v1625_v39, %v1625_v39 }
  0xa9   : > { %v527_v37 = vmul.f32 %v519_v35, %v1607_v20  ;;  %v529_v38 = vmul.f32 %v525_v33, %v1607_v20 }
  0xaa   : > { %v643_v47 = vsel %vm308_vm0, %v637_v42, 0.0  ;;  %v1726_v42 = vld [vmem:[%s1648_s15 + $0x10] sm:$0xff] }
  0xab   : > { %v1631_v41 = vsub.f32 %v511_v8, %v527_v37  ;;  %v1637_v44 = vsub.f32 %v513_v7, %v529_v38  ;;  %v288_v7 = vld [vmem:[%s2162_s4] sm:$0xff] }
  0xac   : > { %741 = vmatpush.msra.mxu1 %v288_v7 }
  0xad   : > { %v535_v46 = vmul.f32 %v1631_v41, %v1631_v41  ;;  %v537_v52 = vmul.f32 %v1637_v44, %v1637_v44 }
  0xaf   : > { %v541_v48 = vsel %vm308_vm0, %v535_v46, 0.0  ;;  %v547_v57 = vsel %vm308_vm0, %v537_v52, 0.0 }
  0xb0   : > { %644 = vadd.xlane.f32.xlu1 %v643_v47  ;;  %v624_v49 = vpop.xlane.xlu1 %623  ;;  %626 = vadd.xlane.f32.xlu0 %v625_v45  ;;  %v1731_v45 = vld [vmem:[%s2161_s3] sm:$0xff] }
  0xb1   : > { %542 = vadd.xlane.f32.xlu2 %v541_v48  ;;  %v630_v50 = vmul.f32 %v624_v49, %v1607_v20  ;;  %v1761_v4 = vperm.slane %v1731_v45, 3 }
  0xb3   : > { %v1662_v55 = vsub.f32 %v614_v12, %v630_v50 }
  0xb5   : > { %v638_v58 = vmul.f32 %v1662_v55, %v1662_v55 }
  0xb7   : > { %v646_v61 = vsel %vm308_vm0, %v638_v58, 0.0  ;;  %v294_v58 = vld [vmem:[%s2162_s4 + $0x30] sm:$0xff] }
  0xb8   : > { %310 = vadd.xlane.f32.xlu1 %v309_v54  ;;  %641 = vadd.xlane.f32.xlu0 %v640_v56  ;;  %v315_v56 = vsel %vm308_vm0, %v1726_v42, 0.0 }
  0xb9   : > { %548 = vadd.xlane.f32.xlu2 %v547_v57  ;;  %v1746_v57 = vperm.slane %v1731_v45, 2 }
  0xc0   : > { %319 = vadd.xlane.f32.xlu1 %v318_v60 }
  0xc1   : > { %647 = vadd.xlane.f32.xlu2 %v646_v61 }
  0xc9   : > { %313 = vadd.xlane.f32.xlu2 %v312_v63 }
  0xd1   : > { %322 = vadd.xlane.f32.xlu2 %v321_v1 }
  0xd9   : > { %328 = vadd.xlane.f32.xlu2 %v327_v3 }
 0x11b   : > { %v546_v8 = vpop.xlane.xlu1 %545  ;;  %v540_v10 = vpop.xlane.xlu0 %539 }
 0x11c   : > { %v552_v9 = vmul.f32 %v546_v8, %v1607_v20  ;;  %v550_v11 = vmul.f32 %v540_v10, %v1607_v20  ;;  %v292_v10 = vld [vmem:[%s2162_s4 + $0x20] sm:$0xff] }
 0x11e   : > { %v1703_v12 = vadd.f32 1e-05, %v552_v9  ;;  %v554_v13 = vadd.f32 1e-05, %v550_v11 }
 0x120   : > { %1341 = vrsqrt.f32 %v1703_v12  ;;  %vm564_vm3 = vweird.f32 %v554_v13  ;;  %vm584_vm7 = vweird.f32 %v1703_v12 }
 0x121   : > { %1343 = vrsqrt.f32 %v554_v13 }
 0x123   : > { %v645_v14 = vpop.xlane.xlu1 %644  ;;  %v627_v16 = vpop.xlane.xlu0 %626 }
 0x124   : > { %v543_v15 = vpop.xlane.xlu2 %542  ;;  %v631_v18 = vmul.f32 %v627_v16, %v1607_v20  ;;  %v653_v47 = vmul.f32 %v645_v14, %v1607_v20 }
 0x125   : > { %v551_v17 = vmul.f32 %v543_v15, %v1607_v20 }
 0x126   : > { %v1708_v19 = vpop.eup %1341  ;;  %v1713_v23 = vsub.f32 %v1628_v40, %v631_v18  ;;  %v1755_v63 = vadd.f32 1e-05, %v653_v47 }
 0x127   : > { %v1344_v21 = vpop.eup %1343  ;;  %v1710_v22 = vadd.f32 1e-05, %v551_v17  ;;  %v579_v24 = vmul.f32 %v1708_v19, %v1703_v12  ;;  %vm585_vm8 = vweird.f32 %v1708_v19 }
 0x128   : > { %v559_v25 = vmul.f32 %v1344_v21, %v554_v13  ;;  %v639_v28 = vmul.f32 %v1713_v23, %v1713_v23  ;;  %vm565_vm2 = vweird.f32 %v1344_v21  ;;  %v1775_v13 = vld [vmem:[%s1648_s15 + $0x28] sm:$0xff]  ;;  %vm1798_vm10 = vmor %vm584_vm7, %vm585_vm8 }
 0x129   : > { %1345 = vrsqrt.f32 %v1710_v22  ;;  %v580_v32 = vmul.f32 %v1708_v19, %v579_v24  ;;  %vm566_vm4 = vmor %vm564_vm3, %vm565_vm2  ;;  %vm574_vm5 = vweird.f32 %v1710_v22  ;;  %vm676_vm2 = vweird.f32 %v1755_v63 }
 0x12a   : > { %v560_v29 = vmul.f32 %v1344_v21, %v559_v25  ;;  %v649_v30 = vsel %vm308_vm0, %v639_v28, 0.0  ;;  %v1792_v28 = vld [vmem:[%s1648_s15 + $0x38] sm:$0xff] }
 0x12b   : > { %v311_v31 = vpop.xlane.xlu1 %310  ;;  %650 = vadd.xlane.f32.xlu0 %v649_v30  ;;  %v642_v35 = vpop.xlane.xlu0 %641  ;;  %v581_v50 = vmul.f32 0.5, %v580_v32  ;;  %v324_v30 = vsel %vm308_vm0, %v1775_v13, 0.0  ;;  %v330_v12 = vsel %vm308_vm0, %v1792_v28, 0.0 }
 0x12c   : > { %v561_v33 = vmul.f32 0.5, %v560_v29  ;;  %v549_v34 = vpop.xlane.xlu2 %548  ;;  %v340_v36 = vmul.f32 %v1607_v20, %v311_v31  ;;  %v652_v38 = vmul.f32 %v642_v35, %v1607_v20 }
 0x12d   : > { %v553_v37 = vmul.f32 %v549_v34, %v1607_v20  ;;  %v582_v6 = vsub.f32 1.5, %v581_v50 }
 0x12e   : > { %v562_v40 = vsub.f32 1.5, %v561_v33  ;;  %v1737_v49 = vsub.f32 %v1658_v53, %v340_v36  ;;  %v1740_v54 = vadd.f32 1e-05, %v652_v38  ;;  %v295_v53 = vld [vmem:[%s2162_s4 + $0x38] sm:$0xff] }
 0x12f   : > { %v1346_v46 = vpop.eup %1345  ;;  %v1734_v48 = vadd.f32 1e-05, %v553_v37  ;;  %780 = vmatpush.msrb.mxu1 %v295_v53 }
 0x130   : > { %v563_v51 = vmul.f32 %v1344_v21, %v562_v40  ;;  %v569_v52 = vmul.f32 %v1346_v46, %v1710_v22  ;;  %v356_v1 = vmul.f32 %v1737_v49, %v1737_v49  ;;  %vm575_vm6 = vweird.f32 %v1346_v46 }
 0x131   : > { %1347 = vrsqrt.f32 %v1734_v48  ;;  %781 = vmatpush.msrb.mxu1 %v294_v58  ;;  %vm1781_vm9 = vmor %vm574_vm5, %vm575_vm6  ;;  %vm594_vm11 = vweird.f32 %v1734_v48  ;;  %vm666_vm14 = vweird.f32 %v1740_v54 }
 0x132   : > { %v567_v60 = vsel %vm566_vm4, %v1344_v21, %v563_v51  ;;  %v570_v61 = vmul.f32 %v1346_v46, %v569_v52  ;;  %1349 = vrsqrt.f32 %v1740_v54  ;;  %v364_v9 = vsel %vm308_vm0, %v356_v1, 0.0 }
 0x133   : > { %v598_v3 = vmul.f32 %v567_v60, %v1613_v27  ;;  %316 = vadd.xlane.f32.xlu0 %v315_v56  ;;  %365 = vadd.xlane.f32.xlu1 %v364_v9  ;;  %1351 = vrsqrt.f32 %v1755_v63  ;;  %v583_v21 = vmul.f32 %v1708_v19, %v582_v6  ;;  %v320_v33 = vpop.xlane.xlu1 %319 }
 0x134   : > { %v571_v7 = vmul.f32 0.5, %v570_v61  ;;  %v648_v8 = vpop.xlane.xlu2 %647  ;;  %782 = vmatpush.msrb.mxu1 %v293_v5  ;;  %v343_v51 = vmul.f32 %v1607_v20, %v320_v33  ;;  %v704_v33 = vperm.slane %v1731_v45, 4 }
 0x135   : > { %v603_v27 = vmul.f32 %v1746_v57, %v598_v3  ;;  %v654_v16 = vmul.f32 %v648_v8, %v1607_v20  ;;  %v587_v36 = vsel %vm1798_vm10, %v1708_v19, %v583_v21 }
 0x136   : > { %v572_v11 = vsub.f32 1.5, %v571_v7  ;;  %783 = vmatpush.msrb.mxu1 %v292_v10  ;;  %v600_v56 = vmul.f32 %v587_v36, %v1611_v26 }
 0x137   : > { %v1348_v14 = vpop.eup %1347  ;;  %v608_v17 = vadd.f32 %v1761_v4, %v603_v27  ;;  %v1809_v34 = vadd.f32 1e-05, %v654_v16 }
 0x138   : > { %v1787_v18 = vpop.eup %1349  ;;  %v573_v24 = vmul.f32 %v1346_v46, %v572_v11  ;;  %v589_v25 = vmul.f32 %v1348_v14, %v1734_v48  ;;  %vm595_vm12 = vweird.f32 %v1348_v14  ;;  %v605_v26 = vmul.f32 %v1746_v57, %v600_v56 }
 0x139   : > { %v661_v29 = vmul.f32 %v1787_v18, %v1740_v54  ;;  %1255 = vmatmul.msk.f32.vlgmr.msra.gmra.mxu1 %vm308_vm0, %v608_v17  ;;  %v1818_v47 = vpop.eup %1351  ;;  %1353 = vrsqrt.f32 %v1809_v34  ;;  %vm1832_vm13 = vmor %vm594_vm11, %vm595_vm12  ;;  %vm667_vm15 = vweird.f32 %v1787_v18  ;;  %vm686_vm5 = vweird.f32 %v1809_v34 }
 0x13a   : > { %v577_v31 = vsel %vm1781_vm9, %v1346_v46, %v573_v24  ;;  %v590_v32 = vmul.f32 %v1348_v14, %v589_v25  ;;  %v671_v53 = vmul.f32 %v1818_v47, %v1755_v63  ;;  %v610_v10 = vadd.f32 %v1761_v4, %v605_v26  ;;  %vm668_vm1 = vmor %vm666_vm14, %vm667_vm15 }
 0x13b   : > { %v599_v35 = vmul.f32 %v577_v31, %v1631_v41  ;;  %v662_v38 = vmul.f32 %v1787_v18, %v661_v29  ;;  %325 = vadd.xlane.f32.xlu0 %v324_v30  ;;  %331 = vadd.xlane.f32.xlu1 %v330_v12  ;;  %vm677_vm3 = vweird.f32 %v1818_v47  ;;  %vm813_vm14 = vcmask 269312  }
 0x13c   : > { %v591_v37 = vmul.f32 0.5, %v590_v32  ;;  %v314_v40 = vpop.xlane.xlu2 %313  ;;  %v672_v3 = vmul.f32 %v1818_v47, %v671_v53  ;;  %vm678_vm4 = vmor %vm676_vm2, %vm677_vm3 }
 0x13d   : > { %v341_v46 = vmul.f32 %v1607_v20, %v314_v40  ;;  %v604_v50 = vmul.f32 %v1746_v57, %v599_v35  ;;  %v663_v60 = vmul.f32 0.5, %v662_v38 }
 0x13e   : > { %v592_v52 = vsub.f32 1.5, %v591_v37 }
 0x13f   : > { %v1826_v41 = vsub.f32 %v1675_v62, %v341_v46  ;;  %v609_v19 = vadd.f32 %v1761_v4, %v604_v50  ;;  %v1840_v62 = vsub.f32 %v1669_v59, %v343_v51  ;;  %v664_v6 = vsub.f32 1.5, %v663_v60  ;;  %v1354_v8 = vpop.eup %1353 }
 0x140   : > { %v593_v58 = vmul.f32 %v1348_v14, %v592_v52  ;;  %v681_v16 = vmul.f32 %v1354_v8, %v1809_v34  ;;  %vm687_vm6 = vweird.f32 %v1354_v8 }
 0x141   : > { %1256 = vmatmul.msk.f32.gmra.mxu1 %vm308_vm0, %v609_v19  ;;  %v357_v48 = vmul.f32 %v1826_v41, %v1826_v41  ;;  %v359_v27 = vmul.f32 %v1840_v62, %v1840_v62  ;;  %v665_v15 = vmul.f32 %v1787_v18, %v664_v6  ;;  %vm688_vm7 = vmor %vm686_vm5, %vm687_vm6 }
 0x142   : > { %v597_v5 = vsel %vm1832_vm13, %v1348_v14, %v593_v58  ;;  %v673_v14 = vmul.f32 0.5, %v672_v3  ;;  %v682_v25 = vmul.f32 %v1354_v8, %v681_v16 }
 0x143   : > { %v367_v1 = vsel %vm308_vm0, %v357_v48, 0.0  ;;  %v601_v11 = vmul.f32 %v597_v5, %v1637_v44  ;;  %v373_v17 = vsel %vm308_vm0, %v359_v27, 0.0  ;;  %v669_v44 = vsel %vm668_vm1, %v1787_v18, %v665_v15 }
 0x144   : > { %368 = vadd.xlane.f32.xlu0 %v367_v1  ;;  %v323_v7 = vpop.xlane.xlu2 %322  ;;  %v674_v24 = vsub.f32 1.5, %v673_v14  ;;  %v700_v30 = vmul.f32 %v669_v44, %v1635_v43  ;;  %v683_v18 = vmul.f32 0.5, %v682_v25 }
 0x145   : > { %v344_v9 = vmul.f32 %v1607_v20, %v323_v7  ;;  %v606_v21 = vmul.f32 %v1746_v57, %v601_v11 }
 0x146   : > { %v675_v57 = vmul.f32 %v1818_v47, %v674_v24  ;;  %v705_v12 = vmul.f32 %v704_v33, %v700_v30 }
 0x147   : > { %v1853_v59 = vsub.f32 %v1680_v0, %v344_v9  ;;  %v611_v31 = vadd.f32 %v1761_v4, %v606_v21  ;;  %v684_v4 = vsub.f32 1.5, %v683_v18 }
 0x148   : > { %v679_v43 = vsel %vm678_vm4, %v1818_v47, %v675_v57 }
 0x149   : > { %1257 = vmatmul.msk.f32.gmra.mxu1 %vm308_vm0, %v610_v10  ;;  %v360_v54 = vmul.f32 %v1853_v59, %v1853_v59  ;;  %v701_v37 = vmul.f32 %v679_v43, %v1625_v39  ;;  %v685_v38 = vmul.f32 %v1354_v8, %v684_v4 }
 0x14b   : > { %v376_v0 = vsel %vm308_vm0, %v360_v54, 0.0  ;;  %v706_v40 = vmul.f32 %v704_v33, %v701_v37  ;;  %v689_v46 = vsel %vm688_vm7, %v1354_v8, %v685_v38 }
 0x14c   : > { %374 = vadd.xlane.f32.xlu0 %v373_v17  ;;  %377 = vadd.xlane.f32.xlu1 %v376_v0  ;;  %v329_v22 = vpop.xlane.xlu2 %328  ;;  %v702_v51 = vmul.f32 %v689_v46, %v1662_v55 }
 0x14d   : > { %v346_v29 = vmul.f32 %v1607_v20, %v329_v22 }
 0x14e   : > { %v707_v47 = vmul.f32 %v704_v33, %v702_v51 }
 0x14f   : > { %v1872_v32 = vsub.f32 %v1685_v2, %v346_v29  ;;  %v709_v2 = vperm.slane %v1731_v45, 5 }
 0x151   : > { %1258 = vmatmul.msk.f32.gmra.mxu1 %vm308_vm0, %v611_v31  ;;  %v362_v63 = vmul.f32 %v1872_v32, %v1872_v32  ;;  %v710_v36 = vadd.f32 %v709_v2, %v705_v12  ;;  %v711_v50 = vadd.f32 %v709_v2, %v706_v40  ;;  %v712_v52 = vadd.f32 %v709_v2, %v707_v47 }
 0x153   : > { %v382_v35 = vsel %vm308_vm0, %v362_v63, 0.0 }
 0x154   : > { %383 = vadd.xlane.f32.xlu0 %v382_v35 }
 0x159   : > { %1259 = vmatmul.msk.f32.vlgmr.msrb.gmra.mxu1 %vm308_vm0, %v710_v36 }
 0x161   : > { %1260 = vmatmul.msk.f32.gmra.mxu1 %vm308_vm0, %v711_v50 }
 0x169   : > { %1261 = vmatmul.msk.f32.gmra.mxu1 %vm308_vm0, %v712_v52 }
 0x19e   : > { %v651_v34 = vpop.xlane.xlu0 %650 }
 0x19f   : > { %v655_v19 = vmul.f32 %v651_v34, %v1607_v20  ;;  %v755_v34 = vperm.slane %v1731_v45, 6 }
 0x1a1   : > { %v659_v56 = vadd.f32 1e-05, %v655_v19 }
 0x1a3   : > { %1355 = vrsqrt.f32 %v659_v56  ;;  %vm696_vm9 = vweird.f32 %v659_v56 }
 0x1a6   : > { %v317_v39 = vpop.xlane.xlu0 %316  ;;  %v366_v58 = vpop.xlane.xlu1 %365 }
 0x1a7   : > { %v342_v53 = vmul.f32 %v1607_v20, %v317_v39  ;;  %v388_v25 = vmul.f32 %v366_v58, %v1607_v20 }
 0x1a9   : > { %v1356_v60 = vpop.eup %1355  ;;  %v1891_v61 = vsub.f32 %v1726_v42, %v342_v53  ;;  %v396_v22 = vadd.f32 1e-05, %v388_v25 }
 0x1aa   : > { %v691_v55 = vmul.f32 %v1356_v60, %v659_v56  ;;  %vm697_vm8 = vweird.f32 %v1356_v60 }
 0x1ab   : > { %v358_v48 = vmul.f32 %v1891_v61, %v1891_v61  ;;  %vm698_vm10 = vmor %vm696_vm9, %vm697_vm8  ;;  %1357 = vrsqrt.f32 %v396_v22  ;;  %vm410_vm11 = vweird.f32 %v396_v22 }
 0x1ac   : > { %v692_v1 = vmul.f32 %v1356_v60, %v691_v55 }
 0x1ad   : > { %v370_v26 = vsel %vm308_vm0, %v358_v48, 0.0 }
 0x1ae   : > { %v693_v3 = vmul.f32 0.5, %v692_v1  ;;  %v326_v5 = vpop.xlane.xlu0 %325  ;;  %371 = vadd.xlane.f32.xlu2 %v370_v26  ;;  %v332_v8 = vpop.xlane.xlu1 %331 }
 0x1af   : > { %v345_v6 = vmul.f32 %v1607_v20, %v326_v5  ;;  %v347_v42 = vmul.f32 %v1607_v20, %v332_v8 }
 0x1b0   : > { %v694_v7 = vsub.f32 1.5, %v693_v3 }
 0x1b1   : > { %v1898_v9 = vsub.f32 %v1775_v13, %v345_v6  ;;  %v1902_v10 = vsub.f32 %v1792_v28, %v347_v42  ;;  %v1358_v57 = vpop.eup %1357 }
 0x1b2   : > { %v695_v27 = vmul.f32 %v1356_v60, %v694_v7  ;;  %v405_v63 = vmul.f32 %v1358_v57, %v396_v22  ;;  %vm411_vm12 = vweird.f32 %v1358_v57 }
 0x1b3   : > { %v361_v11 = vmul.f32 %v1898_v9, %v1898_v9  ;;  %v363_v16 = vmul.f32 %v1902_v10, %v1902_v10  ;;  %vm1936_vm13 = vmor %vm410_vm11, %vm411_vm12 }
 0x1b4   : > { %v699_v14 = vsel %vm698_vm10, %v1356_v60, %v695_v27  ;;  %v406_v35 = vmul.f32 %v1358_v57, %v405_v63 }
 0x1b5   : > { %v379_v15 = vsel %vm308_vm0, %v361_v11, 0.0  ;;  %v703_v13 = vmul.f32 %v699_v14, %v1713_v23  ;;  %v385_v17 = vsel %vm308_vm0, %v363_v16, 0.0 }
 0x1b6   : > { %380 = vadd.xlane.f32.xlu2 %v379_v15  ;;  %386 = vadd.xlane.f32.xlu1 %v385_v17  ;;  %v1912_v28 = vpop.f32.mrf.mxu1  ;;  %v407_v37 = vmul.f32 0.5, %v406_v35  ;;  %v1954_v15 = vperm.slane %v1731_v45, 0 }
 0x1b7   : > { %v708_v54 = vmul.f32 %v704_v33, %v703_v13  ;;  %v369_v29 = vpop.xlane.xlu0 %368 }
 0x1b8   : > { %v389_v30 = vmul.f32 %v369_v29, %v1607_v20  ;;  %v408_v50 = vsub.f32 1.5, %v407_v37 }
 0x1b9   : > { %v713_v0 = vadd.f32 %v709_v2, %v708_v54 }
 0x1ba   : > { %v397_v31 = vadd.f32 1e-05, %v389_v30  ;;  %v409_v19 = vmul.f32 %v1358_v57, %v408_v50  ;;  %v1975_v30 = vperm.slane %v1731_v45, 1 }
 0x1bb   : > { %1262 = vmatmul.msk.f32.gmra.mxu1 %vm308_vm0, %v713_v0 }
 0x1bc   : > { %1359 = vrsqrt.f32 %v397_v31  ;;  %v413_v5 = vsel %vm1936_vm13, %v1358_v57, %v409_v19  ;;  %vm420_vm15 = vweird.f32 %v397_v31 }
 0x1bd   : > { %v484_v17 = vmul.f32 %v413_v5, %v1737_v49 }
 0x1be   : > { %v1914_v21 = vpop.f32.mrf.mxu1 }
 0x1bf   : > { %v375_v43 = vpop.xlane.xlu0 %374  ;;  %v378_v47 = vpop.xlane.xlu1 %377  ;;  %v493_v49 = vmul.f32 %v1954_v15, %v484_v17 }
 0x1c0   : > { %v391_v36 = vmul.f32 %v375_v43, %v1607_v20  ;;  %v392_v39 = vmul.f32 %v378_v47, %v1607_v20 }
 0x1c2   : > { %v1923_v2 = vpop.eup %1359  ;;  %v1928_v46 = vadd.f32 1e-05, %v391_v36  ;;  %v1942_v3 = vadd.f32 1e-05, %v392_v39 }
 0x1c3   : > { %v415_v38 = vmul.f32 %v1923_v2, %v397_v31  ;;  %vm421_vm1 = vweird.f32 %v1923_v2 }
 0x1c4   : > { %vm1965_vm2 = vmor %vm420_vm15, %vm421_vm1  ;;  %vm440_vm6 = vweird.f32 %v1928_v46  ;;  %vm450_vm9 = vweird.f32 %v1942_v3 }
 0x1c5   : > { %v416_v51 = vmul.f32 %v1923_v2, %v415_v38 }
 0x1c6   : > { %v1916_v24 = vpop.f32.mrf.mxu1 }
 0x1c7   : > { %v417_v56 = vmul.f32 0.5, %v416_v51  ;;  %v384_v31 = vpop.xlane.xlu0 %383 }
 0x1c8   : > { %v394_v45 = vmul.f32 %v384_v31, %v1607_v20 }
 0x1c9   : > { %v418_v26 = vsub.f32 1.5, %v417_v56 }
 0x1ca   : > { %v1999_v37 = vadd.f32 1e-05, %v394_v45 }
 0x1cb   : > { %v419_v54 = vmul.f32 %v1923_v2, %v418_v26 }
 0x1cc   : > { %vm470_vm1 = vweird.f32 %v1999_v37 }
 0x1ce   : > { %v752_v44 = vpop.f32.mrf.mxu1 }
 0x1d6   : > { %v785_v23 = vpop.f32.mrf.mxu1 }
 0x1d7   : > { %v786_v14 = vadd.f32 %v785_v23, %v755_v34 }
 0x1d9   : > { %v797_v57 = vadd.f32 %v786_v14, %v1912_v28 }
 0x1db   : > { %v801_v36 = vsel %vm308_vm0, %v1912_v28, %v797_v57 }
 0x1de   : > { %v788_v33 = vpop.f32.mrf.mxu1 }
 0x1df   : > { %v789_v7 = vadd.f32 %v788_v33, %v755_v34  ;;  %v423_v33 = vsel %vm1965_vm2, %v1923_v2, %v419_v54 }
 0x1e0   : > { %v485_v35 = vmul.f32 %v423_v33, %v1826_v41 }
 0x1e1   : > { %v798_v0 = vadd.f32 %v789_v7, %v1914_v21 }
 0x1e2   : > { %v494_v41 = vmul.f32 %v1954_v15, %v485_v35 }
 0x1e4   : > { %v503_v19 = vadd.f32 %v1975_v30, %v494_v41 }
 0x1e6   : > { %v791_v40 = vpop.f32.mrf.mxu1 }
 0x1e7   : > { %v792_v60 = vadd.f32 %v791_v40, %v755_v34 }
 0x1e9   : > { %v799_v8 = vadd.f32 %v792_v60, %v1916_v24 }
 0x1eb   : > { %v803_v25 = vsel %vm308_vm0, %v1916_v24, %v799_v8  ;;  %v802_v24 = vsel %vm308_vm0, %v1914_v21, %v798_v0 }
 0x221   : > { %v372_v18 = vpop.xlane.xlu2 %371 }
 0x222   : > { %v390_v12 = vmul.f32 %v372_v18, %v1607_v20 }
 0x224   : > { %v1921_v4 = vadd.f32 1e-05, %v390_v12  ;;  %v502_v12 = vadd.f32 %v1975_v30, %v493_v49 }
 0x226   : > { %1361 = vrsqrt.f32 %v1921_v4  ;;  %vm430_vm3 = vweird.f32 %v1921_v4  ;;  %v805_v38 = vsel %vm308_vm0, %v502_v12, 1.0 }
 0x227   : > { %1363 = vrsqrt.f32 %v1928_v46 }
 0x228   : > { %1365 = vrsqrt.f32 %v1942_v3 }
 0x229   : > { %v381_v27 = vpop.xlane.xlu2 %380  ;;  %v387_v51 = vpop.xlane.xlu1 %386 }
 0x22a   : > { %v393_v13 = vmul.f32 %v381_v27, %v1607_v20 }
 0x22c   : > { %v1931_v52 = vpop.eup %1361  ;;  %v1971_v23 = vadd.f32 1e-05, %v393_v13 }
 0x22d   : > { %v425_v55 = vmul.f32 %v1931_v52, %v1921_v4  ;;  %v1946_v6 = vpop.eup %1363  ;;  %vm431_vm4 = vweird.f32 %v1931_v52 }
 0x22e   : > { %v435_v16 = vmul.f32 %v1946_v6, %v1928_v46  ;;  %v1366_v63 = vpop.eup %1365  ;;  %1367 = vrsqrt.f32 %v1971_v23  ;;  %vm1994_vm5 = vmor %vm430_vm3, %vm431_vm4  ;;  %vm441_vm7 = vweird.f32 %v1946_v6  ;;  %vm460_vm12 = vweird.f32 %v1971_v23 }
 0x22f   : > { %v426_v42 = vmul.f32 %v1931_v52, %v425_v55  ;;  %v445_v43 = vmul.f32 %v1366_v63, %v1942_v3  ;;  %1369 = vrsqrt.f32 %v1999_v37  ;;  %vm442_vm8 = vmor %vm440_vm6, %vm441_vm7  ;;  %vm451_vm10 = vweird.f32 %v1366_v63 }
 0x230   : > { %v436_v29 = vmul.f32 %v1946_v6, %v435_v16  ;;  %vm452_vm11 = vmor %vm450_vm9, %vm451_vm10 }
 0x231   : > { %v446_v50 = vmul.f32 %v1366_v63, %v445_v43 }
 0x232   : > { %v437_v21 = vmul.f32 0.5, %v436_v29 }
 0x234   : > { %v438_v40 = vsub.f32 1.5, %v437_v21  ;;  %v1368_v47 = vpop.eup %1367 }
 0x235   : > { %v455_v58 = vmul.f32 %v1368_v47, %v1971_v23  ;;  %vm461_vm13 = vweird.f32 %v1368_v47 }
 0x236   : > { %v439_v39 = vmul.f32 %v1946_v6, %v438_v40  ;;  %vm462_vm15 = vmor %vm460_vm12, %vm461_vm13 }
 0x238   : > { %v794_v53 = vpop.f32.mrf.mxu1 }
 0x239   : > { %v795_v48 = vadd.f32 %v794_v53, %v755_v34  ;;  %v395_v34 = vmul.f32 %v387_v51, %v1607_v20  ;;  %v447_v53 = vmul.f32 0.5, %v446_v50  ;;  %v443_v20 = vsel %vm442_vm8, %v1946_v6, %v439_v39 }
 0x23a   : > { %v487_v26 = vmul.f32 %v443_v20, %v1840_v62 }
 0x23b   : > { %v800_v1 = vadd.f32 %v795_v48, %v752_v44  ;;  %1039 = vmatpush.msra.mxu3 %v795_v48  ;;  %v448_v55 = vsub.f32 1.5, %v447_v53  ;;  %v456_v48 = vmul.f32 %v1368_v47, %v455_v58 }
 0x23c   : > { %v496_v27 = vmul.f32 %v1954_v15, %v487_v26 }
 0x23d   : > { %1040 = vmatpush.msra.mxu3 %v792_v60  ;;  %v804_v11 = vsel %vm308_vm0, %v752_v44, %v800_v1  ;;  %v427_v44 = vmul.f32 0.5, %v426_v42  ;;  %v806_v60 = vsel %vm308_vm0, %v503_v19, 1.0  ;;  %v1370_v1 = vpop.eup %1369  ;;  %v449_v5 = vmul.f32 %v1366_v63, %v448_v55 }
 0x23e   : > { %1263 = vmatpush.xpose.msk.msra.mxu2 %vm813_vm14, %v804_v11  ;;  %v457_v8 = vmul.f32 0.5, %v456_v48  ;;  %v505_v62 = vadd.f32 %v1975_v30, %v496_v27  ;;  %vm471_vm2 = vweird.f32 %v1370_v1 }
 0x23f   : > { %1041 = vmatpush.msra.mxu3 %v789_v7  ;;  %v428_v18 = vsub.f32 1.5, %v427_v44  ;;  %v465_v7 = vmul.f32 %v1370_v1, %v1999_v37  ;;  %v453_v3 = vsel %vm452_vm11, %v1366_v63, %v449_v5  ;;  %vm472_vm3 = vmor %vm470_vm1, %vm471_vm2 }
 0x240   : > { %v458_v6 = vsub.f32 1.5, %v457_v8  ;;  %v488_v16 = vmul.f32 %v453_v3, %v1853_v59  ;;  %v808_v0 = vsel %vm308_vm0, %v505_v62, 1.0 }
 0x241   : > { %1042 = vmatpush.msra.mxu3 %v786_v14  ;;  %v429_v2 = vmul.f32 %v1931_v52, %v428_v18  ;;  %v466_v11 = vmul.f32 %v1370_v1, %v465_v7 }
 0x242   : > { %1264 = vmatpush.xpose.msk.msra.mxu2 %vm813_vm14, %v803_v25  ;;  %v459_v17 = vmul.f32 %v1368_v47, %v458_v6  ;;  %v497_v44 = vmul.f32 %v1954_v15, %v488_v16 }
 0x243   : > { %v433_v28 = vsel %vm1994_vm5, %v1931_v52, %v429_v2  ;;  %v403_v52 = vadd.f32 1e-05, %v395_v34  ;;  %v467_v13 = vmul.f32 0.5, %v466_v11 }
 0x244   : > { %v486_v56 = vmul.f32 %v433_v28, %v1891_v61  ;;  %v463_v29 = vsel %vm462_vm15, %v1368_v47, %v459_v17  ;;  %v506_v23 = vadd.f32 %v1975_v30, %v497_v44 }
 0x245   : > { %1371 = vrsqrt.f32 %v403_v52  ;;  %v468_v25 = vsub.f32 1.5, %v467_v13  ;;  %v489_v59 = vmul.f32 %v463_v29, %v1898_v9  ;;  %vm480_vm4 = vweird.f32 %v403_v52 }
 0x246   : > { %1265 = vmatpush.xpose.msk.msra.mxu2 %vm813_vm14, %v802_v24  ;;  %v495_v46 = vmul.f32 %v1954_v15, %v486_v56  ;;  %v809_v57 = vsel %vm308_vm0, %v506_v23, 1.0 }
 0x247   : > { %v469_v49 = vmul.f32 %v1370_v1, %v468_v25  ;;  %v498_v18 = vmul.f32 %v1954_v15, %v489_v59 }
 0x248   : > { %v504_v61 = vadd.f32 %v1975_v30, %v495_v46 }
 0x249   : > { %v473_v33 = vsel %vm472_vm3, %v1370_v1, %v469_v49  ;;  %v507_v63 = vadd.f32 %v1975_v30, %v498_v18 }
 0x24a   : > { %1266 = vmatpush.xpose.msk.msra.mxu2 %vm813_vm14, %v801_v36  ;;  %v807_v42 = vsel %vm308_vm0, %v504_v61, 1.0  ;;  %v490_v45 = vmul.f32 %v473_v33, %v1872_v32 }
 0x24b   : > { %v1372_v14 = vpop.eup %1371  ;;  %v810_v9 = vsel %vm308_vm0, %v507_v63, 1.0 }
 0x24c   : > { %v475_v54 = vmul.f32 %v1372_v14, %v403_v52  ;;  %vm481_vm5 = vweird.f32 %v1372_v14  ;;  %v499_v35 = vmul.f32 %v1954_v15, %v490_v45 }
 0x24d   : > { %1267 = vmatmul.msk.f32.vlgmr.msra.gmra.mxu2 %vm813_vm14, %v805_v38  ;;  %vm482_vm6 = vmor %vm480_vm4, %vm481_vm5 }
 0x24e   : > { %v476_v22 = vmul.f32 %v1372_v14, %v475_v54  ;;  %v508_v43 = vadd.f32 %v1975_v30, %v499_v35 }
 0x250   : > { %v477_v31 = vmul.f32 0.5, %v476_v22  ;;  %v811_v36 = vsel %vm308_vm0, %v508_v43, 1.0 }
 0x252   : > { %v478_v24 = vsub.f32 1.5, %v477_v31 }
 0x254   : > { %v479_v12 = vmul.f32 %v1372_v14, %v478_v24 }
 0x255   : > { %1268 = vmatmul.msk.f32.gmra.mxu2 %vm813_vm14, %v806_v60 }
 0x256   : > { %v483_v21 = vsel %vm482_vm6, %v1372_v14, %v479_v12 }
 0x257   : > { %v491_v2 = vmul.f32 %v483_v21, %v1902_v10 }
 0x259   : > { %v500_v4 = vmul.f32 %v1954_v15, %v491_v2 }
 0x25b   : > { %v509_v32 = vadd.f32 %v1975_v30, %v500_v4 }
 0x25d   : > { %1269 = vmatmul.msk.f32.gmra.mxu2 %vm813_vm14, %v807_v42  ;;  %v812_v37 = vsel %vm308_vm0, %v509_v32, 1.0 }
 0x265   : > { %1270 = vmatmul.msk.f32.gmra.mxu2 %vm813_vm14, %v808_v0 }
 0x26d   : > { %1271 = vmatmul.msk.f32.gmra.mxu2 %vm813_vm14, %v809_v57 }
 0x275   : > { %1272 = vmatmul.msk.f32.gmra.mxu2 %vm813_vm14, %v810_v9 }
 0x27d   : > { %1273 = vmatmul.msk.f32.gmra.mxu2 %vm813_vm14, %v811_v36 }
 0x285   : > { %1274 = vmatmul.msk.f32.gmra.mxu2 %vm813_vm14, %v812_v37 }
 0x2d0   : > { %v867_v38 = vpop.f32.mrf.mxu2 }
 0x2d1   : > { %v891_v41 = vsel %vm308_vm0, %v867_v38, -inf }
 0x2d2   : > { %892 = vmax.xlane.f32.xlu2 %v891_v41 }
 0x2d8   : > { %v870_v40 = vpop.f32.mrf.mxu2 }
 0x2d9   : > { %v894_v50 = vsel %vm308_vm0, %v870_v40, -inf }
 0x2da   : > { %895 = vmax.xlane.f32.xlu0 %v894_v50 }
 0x2e0   : > { %v873_v10 = vpop.f32.mrf.mxu2 }
 0x2e1   : > { %v897_v51 = vsel %vm308_vm0, %v873_v10, -inf }
 0x2e2   : > { %898 = vmax.xlane.f32.xlu1 %v897_v51 }
 0x2e8   : > { %v876_v15 = vpop.f32.mrf.mxu2 }
 0x2e9   : > { %v900_v28 = vsel %vm308_vm0, %v876_v15, -inf }
 0x2ea   : > { %901 = vmax.xlane.f32.xlu2 %v900_v28 }
 0x2f0   : > { %v879_v30 = vpop.f32.mrf.mxu2 }
 0x2f1   : > { %v903_v47 = vsel %vm308_vm0, %v879_v30, -inf }
 0x2f2   : > { %904 = vmax.xlane.f32.xlu0 %v903_v47 }
 0x2f8   : > { %v882_v34 = vpop.f32.mrf.mxu2 }
 0x2f9   : > { %v906_v19 = vsel %vm308_vm0, %v882_v34, -inf }
 0x2fa   : > { %907 = vmax.xlane.f32.xlu1 %v906_v19 }
 0x300   : > { %v885_v56 = vpop.f32.mrf.mxu2 }
 0x301   : > { %v909_v39 = vsel %vm308_vm0, %v885_v56, -inf }
 0x302   : > { %910 = vmax.xlane.f32.xlu2 %v909_v39 }
 0x308   : > { %v888_v53 = vpop.f32.mrf.mxu2 }
 0x309   : > { %v912_v58 = vsel %vm308_vm0, %v888_v53, -inf }
 0x30a   : > { %913 = vmax.xlane.f32.xlu1 %v912_v58 }
 0x345   : > { %v893_v52 = vpop.xlane.xlu2 %892 }
 0x346   : > { %v915_v60 = vsub.f32 %v867_v38, %v893_v52 }
 0x348   : > { %v923_v46 = vmul.f32 1.442695, %v915_v60 }
 0x34a   : > { %1373 = vpow2.f32 %v923_v46 }
 0x34d   : > { %v896_v55 = vpop.xlane.xlu0 %895 }
 0x34e   : > { %v916_v48 = vsub.f32 %v870_v40, %v896_v55 }
 0x350   : > { %v1374_v20 = vpop.eup %1373  ;;  %v925_v1 = vmul.f32 1.442695, %v916_v48  ;;  %v299_v48 = vld [vmem:[%s2162_s4 + $0x58] sm:$0xff] }
 0x351   : > { %v939_v61 = vsel %vm308_vm0, %v1374_v20, 0.0  ;;  %1105 = vmatpush.msra.mxu0 %v299_v48  ;;  %v1413_v48 = vld [vmem:[%s1648_s15 + $0x38] sm:$0xff] }
 0x352   : > { %1375 = vpow2.f32 %v925_v1  ;;  %940 = vadd.xlane.f32.xlu0 %v939_v61  ;;  %v297_v61 = vld [vmem:[%s2162_s4 + $0x48] sm:$0xff] }
 0x355   : > { %v899_v26 = vpop.xlane.xlu1 %898 }
 0x356   : > { %v917_v5 = vsub.f32 %v873_v10, %v899_v26 }
 0x358   : > { %v1376_v7 = vpop.eup %1375  ;;  %v927_v8 = vmul.f32 1.442695, %v917_v5 }
 0x359   : > { %v942_v42 = vsel %vm308_vm0, %v1376_v7, 0.0 }
 0x35a   : > { %1377 = vpow2.f32 %v927_v8  ;;  %943 = vadd.xlane.f32.xlu2 %v942_v42 }
 0x35d   : > { %v902_v27 = vpop.xlane.xlu2 %901 }
 0x35e   : > { %v918_v11 = vsub.f32 %v876_v15, %v902_v27 }
 0x360   : > { %v1378_v6 = vpop.eup %1377  ;;  %v929_v3 = vmul.f32 1.442695, %v918_v11 }
 0x361   : > { %v945_v14 = vsel %vm308_vm0, %v1378_v6, 0.0 }
 0x362   : > { %1379 = vpow2.f32 %v929_v3  ;;  %946 = vadd.xlane.f32.xlu0 %v945_v14 }
 0x365   : > { %v905_v62 = vpop.xlane.xlu0 %904 }
 0x366   : > { %v919_v16 = vsub.f32 %v879_v30, %v905_v62 }
 0x368   : > { %v1380_v13 = vpop.eup %1379  ;;  %v931_v17 = vmul.f32 1.442695, %v919_v16 }
 0x369   : > { %v948_v54 = vsel %vm308_vm0, %v1380_v13, 0.0 }
 0x36a   : > { %1381 = vpow2.f32 %v931_v17  ;;  %949 = vadd.xlane.f32.xlu1 %v948_v54 }
 0x36d   : > { %v908_v0 = vpop.xlane.xlu1 %907 }
 0x36e   : > { %v920_v44 = vsub.f32 %v882_v34, %v908_v0 }
 0x370   : > { %v2063_v25 = vpop.eup %1381  ;;  %v933_v22 = vmul.f32 1.442695, %v920_v44 }
 0x371   : > { %v951_v29 = vsel %vm308_vm0, %v2063_v25, 0.0 }
 0x372   : > { %1383 = vpow2.f32 %v933_v22  ;;  %952 = vadd.xlane.f32.xlu2 %v951_v29  ;;  %v296_v29 = vld [vmem:[%s2162_s4 + $0x40] sm:$0xff] }
 0x375   : > { %v911_v23 = vpop.xlane.xlu2 %910 }
 0x376   : > { %v921_v59 = vsub.f32 %v885_v56, %v911_v23 }
 0x378   : > { %v2067_v49 = vpop.eup %1383  ;;  %v935_v31 = vmul.f32 1.442695, %v921_v59 }
 0x379   : > { %v954_v57 = vsel %vm308_vm0, %v2067_v49, 0.0 }
 0x37a   : > { %1385 = vpow2.f32 %v935_v31  ;;  %955 = vadd.xlane.f32.xlu0 %v954_v57 }
 0x37d   : > { %v914_v18 = vpop.xlane.xlu1 %913 }
 0x37e   : > { %v922_v24 = vsub.f32 %v888_v53, %v914_v18 }
 0x380   : > { %v2071_v33 = vpop.eup %1385  ;;  %v937_v63 = vmul.f32 1.442695, %v922_v24 }
 0x381   : > { %v957_v45 = vsel %vm308_vm0, %v2071_v33, 0.0 }
 0x382   : > { %1387 = vpow2.f32 %v937_v63  ;;  %958 = vadd.xlane.f32.xlu1 %v957_v45  ;;  %v1405_v63 = vld [vmem:[%s2161_s3] sm:$0xff] }
 0x383   : > { %v1068_v45 = vperm.slane %v1405_v63, 7 }
 0x388   : > { %v2075_v12 = vpop.eup %1387 }
 0x389   : > { %v960_v9 = vsel %vm308_vm0, %v2075_v12, 0.0 }
 0x38a   : > { %961 = vadd.xlane.f32.xlu2 %v960_v9 }
 0x3c5   : > { %v941_v35 = vpop.xlane.xlu0 %940 }
 0x3c6   : > { %1389 = vrcp.f32 %v941_v35 }
 0x3cc   : > { %v1390_v21 = vpop.eup %1389 }
 0x3cd   : > { %v971_v43 = vmul.f32 %v1390_v21, %v941_v35  ;;  %v944_v2 = vpop.xlane.xlu2 %943  ;;  %v1406_v35 = vld [vmem:[%s1648_s15] sm:$0xff] }
 0x3ce   : > { %1391 = vrcp.f32 %v944_v2 }
 0x3cf   : > { %v979_v36 = vsub.f32 2.0, %v971_v43 }
 0x3d1   : > { %v987_v4 = vmul.f32 %v1390_v21, %v979_v36  ;;  %v1407_v36 = vld [vmem:[%s1648_s15 + $0x8] sm:$0xff] }
 0x3d3   : > { %v995_v32 = vmul.f32 %v1374_v20, %v987_v4  ;;  %v298_v20 = vld [vmem:[%s2162_s4 + $0x50] sm:$0xff] }
 0x3d4   : > { %v1392_v37 = vpop.eup %1391  ;;  %1106 = vmatpush.msra.mxu0 %v298_v20 }
 0x3d5   : > { %v972_v38 = vmul.f32 %v1392_v37, %v944_v2  ;;  %1275 = vmatmul.msk.f32.vlgmr.msra.gmra.mxu3 %vm308_vm0, %v995_v32  ;;  %v947_v41 = vpop.xlane.xlu0 %946 }
 0x3d6   : > { %1393 = vrcp.f32 %v947_v41  ;;  %1107 = vmatpush.msra.mxu0 %v297_v61 }
 0x3d7   : > { %v980_v40 = vsub.f32 2.0, %v972_v38  ;;  %v1408_v38 = vld [vmem:[%s1648_s15 + $0x10] sm:$0xff] }
 0x3d8   : > { %1108 = vmatpush.msra.mxu0 %v296_v29 }
 0x3d9   : > { %v988_v50 = vmul.f32 %v1392_v37, %v980_v40 }
 0x3db   : > { %v996_v10 = vmul.f32 %v1376_v7, %v988_v50 }
 0x3dc   : > { %v1394_v51 = vpop.eup %1393 }
 0x3dd   : > { %v973_v15 = vmul.f32 %v1394_v51, %v947_v41  ;;  %1276 = vmatmul.msk.f32.gmra.mxu3 %vm308_vm0, %v996_v10  ;;  %v950_v28 = vpop.xlane.xlu1 %949  ;;  %v1409_v10 = vld [vmem:[%s1648_s15 + $0x18] sm:$0xff] }
 0x3de   : > { %1395 = vrcp.f32 %v950_v28 }
 0x3df   : > { %v981_v30 = vsub.f32 2.0, %v973_v15 }
 0x3e1   : > { %v989_v47 = vmul.f32 %v1394_v51, %v981_v30  ;;  %v1410_v30 = vld [vmem:[%s1648_s15 + $0x20] sm:$0xff] }
 0x3e3   : > { %v997_v34 = vmul.f32 %v1378_v6, %v989_v47 }
 0x3e4   : > { %v1396_v19 = vpop.eup %1395 }
 0x3e5   : > { %v974_v56 = vmul.f32 %v1396_v19, %v950_v28  ;;  %1277 = vmatmul.msk.f32.gmra.mxu3 %vm308_vm0, %v997_v34  ;;  %v953_v39 = vpop.xlane.xlu2 %952 }
 0x3e6   : > { %1397 = vrcp.f32 %v953_v39 }
 0x3e7   : > { %v982_v53 = vsub.f32 2.0, %v974_v56  ;;  %v1411_v56 = vld [vmem:[%s1648_s15 + $0x28] sm:$0xff] }
 0x3e9   : > { %v990_v58 = vmul.f32 %v1396_v19, %v982_v53 }
 0x3eb   : > { %v998_v52 = vmul.f32 %v1380_v13, %v990_v58 }
 0x3ec   : > { %v1398_v60 = vpop.eup %1397 }
 0x3ed   : > { %v975_v46 = vmul.f32 %v1398_v60, %v953_v39  ;;  %v956_v55 = vpop.xlane.xlu0 %955  ;;  %1278 = vmatmul.msk.f32.gmra.mxu3 %vm308_vm0, %v998_v52  ;;  %v1412_v52 = vld [vmem:[%s1648_s15 + $0x30] sm:$0xff] }
 0x3ee   : > { %1399 = vrcp.f32 %v956_v55 }
 0x3ef   : > { %v983_v1 = vsub.f32 2.0, %v975_v46 }
 0x3f1   : > { %v991_v26 = vmul.f32 %v1398_v60, %v983_v1 }
 0x3f3   : > { %v999_v5 = vmul.f32 %v2063_v25, %v991_v26 }
 0x3f4   : > { %v1400_v7 = vpop.eup %1399 }
 0x3f5   : > { %v976_v8 = vmul.f32 %v1400_v7, %v956_v55  ;;  %1279 = vmatmul.msk.f32.gmra.mxu3 %vm308_vm0, %v999_v5  ;;  %v959_v42 = vpop.xlane.xlu1 %958 }
 0x3f6   : > { %1401 = vrcp.f32 %v959_v42 }
 0x3f7   : > { %v984_v27 = vsub.f32 2.0, %v976_v8 }
 0x3f9   : > { %v992_v11 = vmul.f32 %v1400_v7, %v984_v27 }
 0x3fb   : > { %v1000_v6 = vmul.f32 %v2067_v49, %v992_v11 }
 0x3fc   : > { %v1402_v3 = vpop.eup %1401 }
 0x3fd   : > { %v977_v14 = vmul.f32 %v1402_v3, %v959_v42  ;;  %v962_v62 = vpop.xlane.xlu2 %961  ;;  %1280 = vmatmul.msk.f32.gmra.mxu3 %vm308_vm0, %v1000_v6 }
 0x3fe   : > { %1403 = vrcp.f32 %v962_v62 }
 0x3ff   : > { %v985_v16 = vsub.f32 2.0, %v977_v14 }
 0x401   : > { %v993_v13 = vmul.f32 %v1402_v3, %v985_v16 }
 0x403   : > { %v1001_v17 = vmul.f32 %v2071_v33, %v993_v13 }
 0x404   : > { %v1404_v54 = vpop.eup %1403 }
 0x405   : > { %v978_v0 = vmul.f32 %v1404_v54, %v962_v62  ;;  %1281 = vmatmul.msk.f32.gmra.mxu3 %vm308_vm0, %v1001_v17 }
 0x407   : > { %v986_v44 = vsub.f32 2.0, %v978_v0 }
 0x409   : > { %v994_v25 = vmul.f32 %v1404_v54, %v986_v44 }
 0x40b   : > { %v1002_v22 = vmul.f32 %v2075_v12, %v994_v25 }
 0x40d   : > { %1282 = vmatmul.msk.f32.gmra.mxu3 %vm308_vm0, %v1002_v22 }
 0x458   : > { %v1044_v23 = vpop.f32.mrf.mxu3 }
 0x459   : > { %1283 = vmatmul.msk.f32.vlgmr.msra.gmra.mxu0 %vm308_vm0, %v1044_v23 }
 0x460   : > { %v1047_v59 = vpop.f32.mrf.mxu3 }
 0x461   : > { %1284 = vmatmul.msk.f32.gmra.mxu0 %vm308_vm0, %v1047_v59 }
 0x468   : > { %v1050_v49 = vpop.f32.mrf.mxu3 }
 0x469   : > { %1285 = vmatmul.msk.f32.gmra.mxu0 %vm308_vm0, %v1050_v49 }
 0x470   : > { %v1053_v31 = vpop.f32.mrf.mxu3 }
 0x471   : > { %1286 = vmatmul.msk.f32.gmra.mxu0 %vm308_vm0, %v1053_v31 }
 0x478   : > { %v1056_v57 = vpop.f32.mrf.mxu3 }
 0x479   : > { %1287 = vmatmul.msk.f32.gmra.mxu0 %vm308_vm0, %v1056_v57 }
 0x480   : > { %v1059_v18 = vpop.f32.mrf.mxu3 }
 0x481   : > { %1288 = vmatmul.msk.f32.gmra.mxu0 %vm308_vm0, %v1059_v18 }
 0x488   : > { %v1062_v24 = vpop.f32.mrf.mxu3 }
 0x489   : > { %1289 = vmatmul.msk.f32.gmra.mxu0 %vm308_vm0, %v1062_v24 }
 0x490   : > { %v1065_v33 = vpop.f32.mrf.mxu3 }
 0x491   : > { %1290 = vmatmul.msk.f32.gmra.mxu0 %vm308_vm0, %v1065_v33 }
 0x4d6   : > { %v1110_v12 = vpop.f32.mrf.mxu0 }
 0x4d7   : > { %v1111_v9 = vadd.f32 %v1110_v12, %v1068_v45 }
 0x4d9   : > { %v1134_v21 = vadd.f32 %v1406_v35, %v1111_v9 }
 0x4db   : > { %1142 = vst.msk [vmem:[%s2119_s21] sm:$0xff] %vm308_vm0, %v1134_v21 }
 0x4de   : > { %v1113_v43 = vpop.f32.mrf.mxu0 }
 0x4df   : > { %v1114_v2 = vadd.f32 %v1113_v43, %v1068_v45 }
 0x4e1   : > { %v1135_v4 = vadd.f32 %v1407_v36, %v1114_v2 }
 0x4e3   : > { %1143 = vst.msk [vmem:[%s2119_s21 + $0x8] sm:$0xff] %vm308_vm0, %v1135_v4 }
 0x4e6   : > { %v1116_v32 = vpop.f32.mrf.mxu0 }
 0x4e7   : > { %v1117_v37 = vadd.f32 %v1116_v32, %v1068_v45 }
 0x4e9   : > { %v1136_v41 = vadd.f32 %v1408_v38, %v1117_v37 }
 0x4eb   : > { %1144 = vst.msk [vmem:[%s2119_s21 + $0x10] sm:$0xff] %vm308_vm0, %v1136_v41 }
 0x4ee   : > { %v1119_v40 = vpop.f32.mrf.mxu0 }
 0x4ef   : > { %v1120_v50 = vadd.f32 %v1119_v40, %v1068_v45 }
 0x4f1   : > { %v1137_v51 = vadd.f32 %v1409_v10, %v1120_v50 }
 0x4f3   : > { %1145 = vst.msk [vmem:[%s2119_s21 + $0x18] sm:$0xff] %vm308_vm0, %v1137_v51 }
 0x4f6   : > { %v1122_v15 = vpop.f32.mrf.mxu0 }
 0x4f7   : > { %v1123_v28 = vadd.f32 %v1122_v15, %v1068_v45 }
 0x4f9   : > { %v1138_v47 = vadd.f32 %v1410_v30, %v1123_v28 }
 0x4fb   : > { %1146 = vst.msk [vmem:[%s2119_s21 + $0x20] sm:$0xff] %vm308_vm0, %v1138_v47 }
 0x4fe   : > { %v1125_v34 = vpop.f32.mrf.mxu0 }
 0x4ff   : > { %v1126_v19 = vadd.f32 %v1125_v34, %v1068_v45 }
 0x501   : > { %v1139_v39 = vadd.f32 %v1411_v56, %v1126_v19 }
 0x503   : > { %1147 = vst.msk [vmem:[%s2119_s21 + $0x28] sm:$0xff] %vm308_vm0, %v1139_v39 }
 0x506   : > { %v1128_v53 = vpop.f32.mrf.mxu0 }
 0x507   : > { %v1129_v58 = vadd.f32 %v1128_v53, %v1068_v45 }
 0x509   : > { %v1140_v60 = vadd.f32 %v1412_v52, %v1129_v58 }
 0x50b   : > { %1148 = vst.msk [vmem:[%s2119_s21 + $0x30] sm:$0xff] %vm308_vm0, %v1140_v60 }
 0x50e   : > { %v1131_v46 = vpop.f32.mrf.mxu0 }
 0x50f   : > { %v1132_v55 = vadd.f32 %v1131_v46, %v1068_v45 }
 0x511   : > { %v1141_v20 = vadd.f32 %v1413_v48, %v1132_v55 }
 0x513   : > { %1149 = vst.msk [vmem:[%s2119_s21 + $0x38] sm:$0xff] %vm308_vm0, %v1141_v20 }
 0x514 PF: > { %p15_p7 = scmp.ge.s32.totalorder %s1535_s23, 4   ;;  %s2179_s18 = smov %s1470_s19 }
 0x515   : > { %s2180_s19 = smov %s1474_s20  ;;  %s2181_s20 = smov %s1545_s26 }
 0x516   : > { %s2182_s21 = smov %s1535_s23  ;;  %17 = sbr.rel (!%p15_p7) target bundleno = 3 (0x3), region = 86 }
 0x51b   :  { %1171 = vsyncpa [#allocation3], 1 }
 0x51c   :  { %1173 = vsyncpa [#allocation3 + $0x1], 1 }

</bundles_post_ra>
